<compile_context>
chip_gen: v7x
topology: tpu7x:2x2x1
jax: 0.10.0
libtpu: 0.0.40
codegen_flags: <defaults>
</compile_context>

<pallas_src>
from functools import partial

import jax
import jax.numpy as jnp
from jax.experimental import pallas as pl
from jax.experimental.pallas import tpu as pltpu


# ----------------------------- Pallas kernel --------------------------------
def _cnn_lstm_kernel(x_ref, fpk_ref, wpk_ref, out_ref, *, n_layers, H, S):
    # x_ref:   (C_in*3 + 1, B_pad) f32  conv window flattened+transposed; last row = 1
    # fpk_ref: (S + L + 2, Wf)     f32  packed small params:
    #            rows [0, S)    : [conv_w | conv_b]                     (C_in*3+1 cols)
    #            row  S         : W_ih layer-0 (input dim 1), g-cols x2 (4H cols)
    #            row  S+1       : b_ih0 + b_hh0, g-slice x2             (4H cols)
    #            rows S+2..S+L  : b_ih_l + b_hh_l for l=1..L-1, g-slice x2
    #            row  S+L+1     : fc bias                               (O_pad cols)
    # wpk_ref: (H + 2*(L-1)*H + S*H, Ww) bf16  packed matmul weights:
    #            rows [0, H)                      : W_hh0^T, g-cols x2
    #            per l=1..L-1: W_ih_l^T then W_hh_l^T (H rows each), g-cols x2
    #            rows [H + 2*(L-1)*H, +S*H)       : fc_w^T
    # out_ref: (B_pad, O_pad) f32
    B = x_ref.shape[1]
    L = n_layers
    H4 = 4 * H
    O_pad = out_ref.shape[1]
    C3p1 = x_ref.shape[0]
    fc_row0 = H + 2 * (L - 1) * H

    # Conv1d(k=3, out length 1) + bias + ReLU as one dense matmul
    # (bias folded via the constant-1 row appended to x).
    conv_sb = jnp.maximum(
        jnp.dot(fpk_ref[0:S, 0:C3p1], x_ref[...],
                preferred_element_type=jnp.float32), 0.0)            # (S, B)

    # Layer-0 input-gate contribution for every timestep, bias folded
    # (LSTM input dim == 1, so this is a broadcasted scalar multiply).
    wih0 = fpk_ref[S:S + 1, 0:H4]                                    # (1, 4H)
    b0 = fpk_ref[S + 1:S + 2, 0:H4]                                  # (1, 4H)
    ih0 = conv_sb[:, :, None] * wih0[None] + b0[None]                # (S, B, 4H)

    whh0 = wpk_ref[0:H, 0:H4]                                        # (H, 4H) bf16
    mm_dtype = whh0.dtype
    fcb = fpk_ref[S + L + 1:S + L + 2, 0:O_pad]                      # (1, O_pad)

    def cell(gates, c_prev):
        # One full-width sigmoid over all 4H gate lanes; the g gate uses
        # tanh(x) = 2*sigmoid(2x) - 1 (its weight columns / bias slice are
        # pre-scaled by 2 host-side), so only tanh(c) remains as a second EUP op.
        sig = jax.nn.sigmoid(gates)
        i = sig[:, 0 * H:1 * H]
        f = sig[:, 1 * H:2 * H]
        g = 2.0 * sig[:, 2 * H:3 * H] - 1.0
        o = sig[:, 3 * H:4 * H]
        c = f * c_prev + i * g
        h = o * jnp.tanh(c)
        return h, c

    # FC accumulator (one f32 vreg at B_pad=8, O_pad=128), fed on the fly from
    # the top layer's hidden states; partial products have no downstream
    # dependence and hide under the next cell's EUP/VPU work.
    acc = jnp.broadcast_to(fcb, (B, O_pad))

    def fc_step(acc, h, t):
        fcw_t = wpk_ref[fc_row0 + t * H:fc_row0 + (t + 1) * H, 0:O_pad]  # (H, O_pad) bf16
        return acc + jnp.dot(h.astype(mm_dtype), fcw_t,
                             preferred_element_type=jnp.float32)

    # ---- layer 0: time-unrolled recurrence, input-gate term precomputed ----
    h = jnp.zeros((B, H), jnp.float32)
    c = jnp.zeros((B, H), jnp.float32)
    h_seq = []
    top = (L == 1)
    for t in range(S):                       # static, fully unrolled
        gates = ih0[t] + jnp.dot(h.astype(mm_dtype), whh0,
                                 preferred_element_type=jnp.float32)
        h, c = cell(gates, c)
        if top:
            acc = fc_step(acc, h, t)
        else:
            h_seq.append(h)

    # ---- layers 1..L-1, layer-major: one batched (S*B,H)@(H,4H) input-gate
    #      matmul per layer; only the (B,H)@(H,4H) recurrent matmul stays in
    #      the unrolled timestep loop (no per-step concat, K = H not 2H) ----
    for l in range(1, L):
        r0 = H + 2 * (l - 1) * H
        wih_l = wpk_ref[r0:r0 + H, 0:H4]                             # (H, 4H) bf16
        whh_l = wpk_ref[r0 + H:r0 + 2 * H, 0:H4]                     # (H, 4H) bf16
        b_l = fpk_ref[S + 1 + l:S + 2 + l, 0:H4]                     # (1, 4H)
        below = jnp.concatenate(h_seq, axis=0).astype(mm_dtype)      # (S*B, H)
        ih_l = jnp.dot(below, wih_l,
                       preferred_element_type=jnp.float32) + b_l     # (S*B, 4H)

        h = jnp.zeros((B, H), jnp.float32)
        c = jnp.zeros((B, H), jnp.float32)
        top = (l == L - 1)
        new_seq = []
        for t in range(S):                   # static, fully unrolled
            gates = ih_l[t * B:(t + 1) * B, :] + jnp.dot(
                h.astype(mm_dtype), whh_l, preferred_element_type=jnp.float32)
            h, c = cell(gates, c)
            if top:
                acc = fc_step(acc, h, t)
            else:
                new_seq.append(h)
        h_seq = new_seq

    out_ref[...] = acc                       # (8, 128) f32 -> unmasked lane-dense store


# ------------------------------- wrapper -------------------------------------
@partial(jax.jit, static_argnames=("n_layers", "hidden", "cnn_size", "out_dim"))
def cnn_lstm_forward(x, fpk, wpk, *, n_layers, hidden, cnn_size, out_dim):
    B = x.shape[0]
    B_pad = max(8, ((B + 7) // 8) * 8)       # sublane fill -> unmasked output store
    O_pad = wpk.shape[1]

    # Glue forced by the module: conv output length is 1, so flatten the
    # (C_in, 3) window, transpose to (C_in*3, B), and append a constant-1 row
    # so the conv bias folds into the conv matmul.
    x_p = jnp.zeros((B_pad, x.shape[1] * x.shape[2]), jnp.float32)
    x_p = x_p.at[:B].set(x.reshape(B, -1).astype(jnp.float32))
    x_aug = jnp.concatenate([x_p.T, jnp.ones((1, B_pad), jnp.float32)], axis=0)

    vmem = pl.BlockSpec(memory_space=pltpu.MemorySpace.VMEM)
    out = pl.pallas_call(
        partial(_cnn_lstm_kernel, n_layers=n_layers, H=hidden, S=cnn_size),
        out_shape=jax.ShapeDtypeStruct((B_pad, O_pad), jnp.float32),
        in_specs=[vmem, vmem, vmem],         # 3 input DMAs (x, f32 pack, bf16 pack)
        out_specs=vmem,
    )(x_aug, fpk, wpk)
    return out[:B, :out_dim]                 # drop batch/lane padding


# ------------------------ deterministic parameter init -----------------------
def init_params(key, input_size, cnn_size, hidden_size, n_layers, output_size,
                seq_length):
    assert hidden_size == seq_length, (
        "CNNLSTMModel.forward only type-checks when hidden_size == seq_length")
    H = hidden_size
    keys = jax.random.split(key, 4 + n_layers)

    def u(k, shape, fan):
        bound = 1.0 / jnp.sqrt(jnp.float32(fan))
        return jax.random.uniform(k, shape, jnp.float32, -bound, bound)

    p = {}
    p["conv_w"] = u(keys[0], (cnn_size, input_size, 3), input_size * 3)
    p["conv_b"] = u(keys[1], (cnn_size,), input_size * 3)
    p["w_ih"], p["w_hh"], p["b"] = [], [], []
    for l in range(n_layers):
        in_sz = 1 if l == 0 else H
        k0, k1, k2, k3 = jax.random.split(keys[2 + l], 4)
        p["w_ih"].append(u(k0, (4 * H, in_sz), H))
        p["w_hh"].append(u(k1, (4 * H, H), H))
        p["b"].append(u(k2, (4 * H,), H) + u(k3, (4 * H,), H))     # b_ih + b_hh
    p["fc_w"] = u(keys[2 + n_layers], (output_size, cnn_size * seq_length),
                  cnn_size * seq_length)
    p["fc_b"] = u(keys[3 + n_layers], (output_size,), cnn_size * seq_length)
    return p


def to_kernel_layout(p, input_size, cnn_size, hidden_size, n_layers, output_size,
                     o_pad=128):
    """Pack all parameters into one f32 array and one bf16 array (3 DMAs total
    with x), pre-scaling the g-gate columns/bias by 2 for the tanh->sigmoid
    rewrite inside the kernel."""
    H, S, L, O = hidden_size, cnn_size, n_layers, output_size
    assert O <= o_pad, "output_size must fit within the padded lane dimension"
    H4 = 4 * H
    C3 = input_size * 3

    def scale_g(w):   # PyTorch gate order (i, f, g, o): scale the g block by 2
        return w.at[..., 2 * H:3 * H].multiply(2.0)

    # f32 pack: conv (weight|bias), layer-0 input weight, all biases, fc bias.
    Wf = max(C3 + 1, H4, o_pad)
    fpk = jnp.zeros((S + L + 2, Wf), jnp.float32)
    convwb = jnp.concatenate(
        [p["conv_w"].reshape(S, C3), p["conv_b"][:, None]], axis=1)   # (S, C3+1)
    fpk = fpk.at[0:S, 0:C3 + 1].set(convwb)
    fpk = fpk.at[S, 0:H4].set(scale_g(p["w_ih"][0].T)[0])             # (4H,)
    fpk = fpk.at[S + 1, 0:H4].set(scale_g(p["b"][0]))
    for l in range(1, L):
        fpk = fpk.at[S + 1 + l, 0:H4].set(scale_g(p["b"][l]))
    fpk = fpk.at[S + L + 1, 0:O].set(p["fc_b"])

    # bf16 pack: W_hh0^T, [W_ih_l^T; W_hh_l^T] for l>=1, fc_w^T.
    Ww = max(H4, o_pad)
    wpk = jnp.zeros((H + 2 * (L - 1) * H + S * H, Ww), jnp.float32)
    wpk = wpk.at[0:H, 0:H4].set(scale_g(p["w_hh"][0].T))
    for l in range(1, L):
        r0 = H + 2 * (l - 1) * H
        wpk = wpk.at[r0:r0 + H, 0:H4].set(scale_g(p["w_ih"][l].T))
        wpk = wpk.at[r0 + H:r0 + 2 * H, 0:H4].set(scale_g(p["w_hh"][l].T))
    fc0 = H + 2 * (L - 1) * H
    # (t, h) flattened row order matches out.reshape(B, -1) in the reference.
    wpk = wpk.at[fc0:fc0 + S * H, 0:O].set(p["fc_w"].T)
    return fpk, wpk.astype(jnp.bfloat16)


# ------------------------ pure-JAX reference (PyTorch semantics) -------------
def reference_forward(x, p, n_layers, H):
    B = x.shape[0]
    conv = jnp.einsum("bck,ock->bo", x, p["conv_w"]) + p["conv_b"]
    conv = jnp.maximum(conv, 0.0)                                  # (B, cnn_size)
    S = conv.shape[1]
    hs = [jnp.zeros((B, H), jnp.float32) for _ in range(n_layers)]
    cs = [jnp.zeros((B, H), jnp.float32) for _ in range(n_layers)]
    outs = []
    for t in range(S):
        inp = conv[:, t:t + 1]                                     # (B, 1)
        for l in range(n_layers):
            gates = inp @ p["w_ih"][l].T + hs[l] @ p["w_hh"][l].T + p["b"][l]
            i = jax.nn.sigmoid(gates[:, :H])
            f = jax.nn.sigmoid(gates[:, H:2 * H])
            g = jnp.tanh(gates[:, 2 * H:3 * H])
            o = jax.nn.sigmoid(gates[:, 3 * H:])
            cs[l] = f * cs[l] + i * g
            hs[l] = o * jnp.tanh(cs[l])
            inp = hs[l]
        outs.append(hs[-1])
    flat = jnp.stack(outs, axis=1).reshape(B, -1)                  # (B, S*H)
    return flat @ p["fc_w"].T + p["fc_b"]


# --------------------------------- main ---------------------------------------
if __name__ == "__main__":
    # Module hyper-parameters (hidden_size == seq_length, spatial L == kernel_size == 3).
    input_size, cnn_size, hidden_size = 4, 8, 32
    n_layers, output_size, seq_length = 2, 5, 32
    batch = 2

    key = jax.random.PRNGKey(0)
    k_param, k_x = jax.random.split(key)
    params = init_params(k_param, input_size, cnn_size, hidden_size, n_layers,
                         output_size, seq_length)
    x = jax.random.normal(k_x, (batch, input_size, 3), jnp.float32)

    fpk, wpk = to_kernel_layout(params, input_size, cnn_size, hidden_size,
                                n_layers, output_size)
    out = jax.block_until_ready(
        cnn_lstm_forward(x, fpk, wpk, n_layers=n_layers, hidden=hidden_size,
                         cnn_size=cnn_size, out_dim=output_size))

    ref = reference_forward(x, params, n_layers, hidden_size)
    assert out.shape == (batch, output_size)
    assert bool(jnp.all(jnp.isfinite(out)))
    # Tolerance accounts for bf16 MXU operands on the recurrent and FC matmuls
    # (all elementwise gate math and accumulation stay in f32).
    assert jnp.allclose(out, ref, atol=2.5e-2, rtol=2.5e-2), (out, ref)
    print("KERNEL_OK")
</pallas_src>

<mosaic_0001>
module attributes {stable_mosaic.version = 11 : i64} {
  func.func @_cnn_lstm_kernel(%arg0: memref<13x8xf32, #tpu.memory_space<vmem>>, %arg1: memref<12x128xf32, #tpu.memory_space<vmem>>, %arg2: memref<352x128xbf16, #tpu.memory_space<vmem>>, %arg3: memref<8x128xf32, #tpu.memory_space<vmem>>) attributes {dimension_semantics = [], scalar_prefetch = 0 : i64, scratch_operands = 0 : i64, tpu.core_type = #tpu.core_type<tc>} {
    %c0 = arith.constant 0 : index
    %c0_0 = arith.constant 0 : index
    %0 = vector.load %arg1[%c0, %c0_0] : memref<12x128xf32, #tpu.memory_space<vmem>>, vector<8x13xf32>
    %c0_1 = arith.constant 0 : index
    %c0_2 = arith.constant 0 : index
    %1 = vector.load %arg0[%c0_1, %c0_2] : memref<13x8xf32, #tpu.memory_space<vmem>>, vector<13x8xf32>
    %cst = arith.constant dense<0.000000e+00> : vector<8x8xf32>
    %2 = tpu.matmul %0, %1, %cst {dimension_numbers = #tpu.dot_dimension_numbers<[1], [0], [0], [1], [0, 0, 1, 1], [], []>} : vector<8x13xf32>, vector<13x8xf32>, vector<8x8xf32> -> vector<8x8xf32>
    %cst_3 = arith.constant 0.000000e+00 : f32
    %3 = vector.broadcast %cst_3 : f32 to vector<8x8xf32>
    %4 = arith.maximumf %2, %3 : vector<8x8xf32>
    %c8 = arith.constant 8 : index
    %c0_4 = arith.constant 0 : index
    %5 = vector.load %arg1[%c8, %c0_4] : memref<12x128xf32, #tpu.memory_space<vmem>>, vector<1x128xf32>
    %c9 = arith.constant 9 : index
    %c0_5 = arith.constant 0 : index
    %6 = vector.load %arg1[%c9, %c0_5] : memref<12x128xf32, #tpu.memory_space<vmem>>, vector<1x128xf32>
    %7 = vector.shape_cast %4 : vector<8x8xf32> to vector<8x8x1xf32>
    %8 = vector.shape_cast %5 : vector<1x128xf32> to vector<1x1x128xf32>
    %9 = vector.broadcast %7 : vector<8x8x1xf32> to vector<8x8x128xf32>
    %10 = vector.broadcast %8 : vector<1x1x128xf32> to vector<8x8x128xf32>
    %11 = arith.mulf %9, %10 : vector<8x8x128xf32>
    %12 = vector.shape_cast %6 : vector<1x128xf32> to vector<1x1x128xf32>
    %13 = vector.broadcast %12 : vector<1x1x128xf32> to vector<8x8x128xf32>
    %14 = arith.addf %11, %13 : vector<8x8x128xf32>
    %c0_6 = arith.constant 0 : index
    %c0_7 = arith.constant 0 : index
    %15 = vector.load %arg2[%c0_6, %c0_7] : memref<352x128xbf16, #tpu.memory_space<vmem>>, vector<32x128xbf16>
    %c11 = arith.constant 11 : index
    %c0_8 = arith.constant 0 : index
    %16 = vector.load %arg1[%c11, %c0_8] : memref<12x128xf32, #tpu.memory_space<vmem>>, vector<1x128xf32>
    %17 = vector.shape_cast %16 : vector<1x128xf32> to vector<1x128xf32>
    %18 = vector.broadcast %17 : vector<1x128xf32> to vector<8x128xf32>
    %cst_9 = arith.constant 0.000000e+00 : f32
    %19 = vector.broadcast %cst_9 : f32 to vector<8x32xf32>
    %cst_10 = arith.constant 0.000000e+00 : f32
    %20 = vector.broadcast %cst_10 : f32 to vector<8x32xf32>
    %21 = vector.extract_strided_slice %14 {offsets = [0, 0, 0], sizes = [1, 8, 128], strides = [1, 1, 1]} : vector<8x8x128xf32> to vector<1x8x128xf32>
    %22 = vector.shape_cast %21 : vector<1x8x128xf32> to vector<8x128xf32>
    %23 = arith.truncf %19 : vector<8x32xf32> to vector<8x32xbf16>
    %cst_11 = arith.constant dense<0.000000e+00> : vector<8x128xf32>
    %24 = tpu.matmul %23, %15, %cst_11 {dimension_numbers = #tpu.dot_dimension_numbers<[1], [0], [0], [1], [0, 0, 1, 1], [], []>} : vector<8x32xbf16>, vector<32x128xbf16>, vector<8x128xf32> -> vector<8x128xf32>
    %25 = arith.addf %22, %24 : vector<8x128xf32>
    %26 = arith.negf %25 : vector<8x128xf32>
    %27 = math.exp %26 : vector<8x128xf32>
    %cst_12 = arith.constant 1.000000e+00 : f32
    %28 = vector.broadcast %cst_12 : f32 to vector<8x128xf32>
    %29 = arith.addf %28, %27 : vector<8x128xf32>
    %30 = arith.divf %28, %29 : vector<8x128xf32>
    %31 = vector.extract_strided_slice %30 {offsets = [0, 0], sizes = [8, 32], strides = [1, 1]} : vector<8x128xf32> to vector<8x32xf32>
    %32 = vector.extract_strided_slice %30 {offsets = [0, 32], sizes = [8, 32], strides = [1, 1]} : vector<8x128xf32> to vector<8x32xf32>
    %33 = vector.extract_strided_slice %30 {offsets = [0, 64], sizes = [8, 32], strides = [1, 1]} : vector<8x128xf32> to vector<8x32xf32>
    %cst_13 = arith.constant 2.000000e+00 : f32
    %34 = vector.broadcast %cst_13 : f32 to vector<8x32xf32>
    %35 = arith.mulf %34, %33 : vector<8x32xf32>
    %cst_14 = arith.constant 1.000000e+00 : f32
    %36 = vector.broadcast %cst_14 : f32 to vector<8x32xf32>
    %37 = arith.subf %35, %36 : vector<8x32xf32>
    %38 = vector.extract_strided_slice %30 {offsets = [0, 96], sizes = [8, 32], strides = [1, 1]} : vector<8x128xf32> to vector<8x32xf32>
    %39 = arith.mulf %32, %20 : vector<8x32xf32>
    %40 = arith.mulf %31, %37 : vector<8x32xf32>
    %41 = arith.addf %39, %40 : vector<8x32xf32>
    %42 = math.tanh %41 : vector<8x32xf32>
    %43 = arith.mulf %38, %42 : vector<8x32xf32>
    %44 = vector.extract_strided_slice %14 {offsets = [1, 0, 0], sizes = [1, 8, 128], strides = [1, 1, 1]} : vector<8x8x128xf32> to vector<1x8x128xf32>
    %45 = vector.shape_cast %44 : vector<1x8x128xf32> to vector<8x128xf32>
    %46 = arith.truncf %43 : vector<8x32xf32> to vector<8x32xbf16>
    %cst_15 = arith.constant dense<0.000000e+00> : vector<8x128xf32>
    %47 = tpu.matmul %46, %15, %cst_15 {dimension_numbers = #tpu.dot_dimension_numbers<[1], [0], [0], [1], [0, 0, 1, 1], [], []>} : vector<8x32xbf16>, vector<32x128xbf16>, vector<8x128xf32> -> vector<8x128xf32>
    %48 = arith.addf %45, %47 : vector<8x128xf32>
    %49 = arith.negf %48 : vector<8x128xf32>
    %50 = math.exp %49 : vector<8x128xf32>
    %cst_16 = arith.constant 1.000000e+00 : f32
    %51 = vector.broadcast %cst_16 : f32 to vector<8x128xf32>
    %52 = arith.addf %51, %50 : vector<8x128xf32>
    %53 = arith.divf %51, %52 : vector<8x128xf32>
    %54 = vector.extract_strided_slice %53 {offsets = [0, 0], sizes = [8, 32], strides = [1, 1]} : vector<8x128xf32> to vector<8x32xf32>
    %55 = vector.extract_strided_slice %53 {offsets = [0, 32], sizes = [8, 32], strides = [1, 1]} : vector<8x128xf32> to vector<8x32xf32>
    %56 = vector.extract_strided_slice %53 {offsets = [0, 64], sizes = [8, 32], strides = [1, 1]} : vector<8x128xf32> to vector<8x32xf32>
    %cst_17 = arith.constant 2.000000e+00 : f32
    %57 = vector.broadcast %cst_17 : f32 to vector<8x32xf32>
    %58 = arith.mulf %57, %56 : vector<8x32xf32>
    %cst_18 = arith.constant 1.000000e+00 : f32
    %59 = vector.broadcast %cst_18 : f32 to vector<8x32xf32>
    %60 = arith.subf %58, %59 : vector<8x32xf32>
    %61 = vector.extract_strided_slice %53 {offsets = [0, 96], sizes = [8, 32], strides = [1, 1]} : vector<8x128xf32> to vector<8x32xf32>
    %62 = arith.mulf %55, %41 : vector<8x32xf32>
    %63 = arith.mulf %54, %60 : vector<8x32xf32>
    %64 = arith.addf %62, %63 : vector<8x32xf32>
    %65 = math.tanh %64 : vector<8x32xf32>
    %66 = arith.mulf %61, %65 : vector<8x32xf32>
    %67 = vector.extract_strided_slice %14 {offsets = [2, 0, 0], sizes = [1, 8, 128], strides = [1, 1, 1]} : vector<8x8x128xf32> to vector<1x8x128xf32>
    %68 = vector.shape_cast %67 : vector<1x8x128xf32> to vector<8x128xf32>
    %69 = arith.truncf %66 : vector<8x32xf32> to vector<8x32xbf16>
    %cst_19 = arith.constant dense<0.000000e+00> : vector<8x128xf32>
    %70 = tpu.matmul %69, %15, %cst_19 {dimension_numbers = #tpu.dot_dimension_numbers<[1], [0], [0], [1], [0, 0, 1, 1], [], []>} : vector<8x32xbf16>, vector<32x128xbf16>, vector<8x128xf32> -> vector<8x128xf32>
    %71 = arith.addf %68, %70 : vector<8x128xf32>
    %72 = arith.negf %71 : vector<8x128xf32>
    %73 = math.exp %72 : vector<8x128xf32>
    %cst_20 = arith.constant 1.000000e+00 : f32
    %74 = vector.broadcast %cst_20 : f32 to vector<8x128xf32>
    %75 = arith.addf %74, %73 : vector<8x128xf32>
    %76 = arith.divf %74, %75 : vector<8x128xf32>
    %77 = vector.extract_strided_slice %76 {offsets = [0, 0], sizes = [8, 32], strides = [1, 1]} : vector<8x128xf32> to vector<8x32xf32>
    %78 = vector.extract_strided_slice %76 {offsets = [0, 32], sizes = [8, 32], strides = [1, 1]} : vector<8x128xf32> to vector<8x32xf32>
    %79 = vector.extract_strided_slice %76 {offsets = [0, 64], sizes = [8, 32], strides = [1, 1]} : vector<8x128xf32> to vector<8x32xf32>
    %cst_21 = arith.constant 2.000000e+00 : f32
    %80 = vector.broadcast %cst_21 : f32 to vector<8x32xf32>
    %81 = arith.mulf %80, %79 : vector<8x32xf32>
    %cst_22 = arith.constant 1.000000e+00 : f32
    %82 = vector.broadcast %cst_22 : f32 to vector<8x32xf32>
    %83 = arith.subf %81, %82 : vector<8x32xf32>
    %84 = vector.extract_strided_slice %76 {offsets = [0, 96], sizes = [8, 32], strides = [1, 1]} : vector<8x128xf32> to vector<8x32xf32>
    %85 = arith.mulf %78, %64 : vector<8x32xf32>
    %86 = arith.mulf %77, %83 : vector<8x32xf32>
    %87 = arith.addf %85, %86 : vector<8x32xf32>
    %88 = math.tanh %87 : vector<8x32xf32>
    %89 = arith.mulf %84, %88 : vector<8x32xf32>
    %90 = vector.extract_strided_slice %14 {offsets = [3, 0, 0], sizes = [1, 8, 128], strides = [1, 1, 1]} : vector<8x8x128xf32> to vector<1x8x128xf32>
    %91 = vector.shape_cast %90 : vector<1x8x128xf32> to vector<8x128xf32>
    %92 = arith.truncf %89 : vector<8x32xf32> to vector<8x32xbf16>
    %cst_23 = arith.constant dense<0.000000e+00> : vector<8x128xf32>
    %93 = tpu.matmul %92, %15, %cst_23 {dimension_numbers = #tpu.dot_dimension_numbers<[1], [0], [0], [1], [0, 0, 1, 1], [], []>} : vector<8x32xbf16>, vector<32x128xbf16>, vector<8x128xf32> -> vector<8x128xf32>
    %94 = arith.addf %91, %93 : vector<8x128xf32>
    %95 = arith.negf %94 : vector<8x128xf32>
    %96 = math.exp %95 : vector<8x128xf32>
    %cst_24 = arith.constant 1.000000e+00 : f32
    %97 = vector.broadcast %cst_24 : f32 to vector<8x128xf32>
    %98 = arith.addf %97, %96 : vector<8x128xf32>
    %99 = arith.divf %97, %98 : vector<8x128xf32>
    %100 = vector.extract_strided_slice %99 {offsets = [0, 0], sizes = [8, 32], strides = [1, 1]} : vector<8x128xf32> to vector<8x32xf32>
    %101 = vector.extract_strided_slice %99 {offsets = [0, 32], sizes = [8, 32], strides = [1, 1]} : vector<8x128xf32> to vector<8x32xf32>
    %102 = vector.extract_strided_slice %99 {offsets = [0, 64], sizes = [8, 32], strides = [1, 1]} : vector<8x128xf32> to vector<8x32xf32>
    %cst_25 = arith.constant 2.000000e+00 : f32
    %103 = vector.broadcast %cst_25 : f32 to vector<8x32xf32>
    %104 = arith.mulf %103, %102 : vector<8x32xf32>
    %cst_26 = arith.constant 1.000000e+00 : f32
    %105 = vector.broadcast %cst_26 : f32 to vector<8x32xf32>
    %106 = arith.subf %104, %105 : vector<8x32xf32>
    %107 = vector.extract_strided_slice %99 {offsets = [0, 96], sizes = [8, 32], strides = [1, 1]} : vector<8x128xf32> to vector<8x32xf32>
    %108 = arith.mulf %101, %87 : vector<8x32xf32>
    %109 = arith.mulf %100, %106 : vector<8x32xf32>
    %110 = arith.addf %108, %109 : vector<8x32xf32>
    %111 = math.tanh %110 : vector<8x32xf32>
    %112 = arith.mulf %107, %111 : vector<8x32xf32>
    %113 = vector.extract_strided_slice %14 {offsets = [4, 0, 0], sizes = [1, 8, 128], strides = [1, 1, 1]} : vector<8x8x128xf32> to vector<1x8x128xf32>
    %114 = vector.shape_cast %113 : vector<1x8x128xf32> to vector<8x128xf32>
    %115 = arith.truncf %112 : vector<8x32xf32> to vector<8x32xbf16>
    %cst_27 = arith.constant dense<0.000000e+00> : vector<8x128xf32>
    %116 = tpu.matmul %115, %15, %cst_27 {dimension_numbers = #tpu.dot_dimension_numbers<[1], [0], [0], [1], [0, 0, 1, 1], [], []>} : vector<8x32xbf16>, vector<32x128xbf16>, vector<8x128xf32> -> vector<8x128xf32>
    %117 = arith.addf %114, %116 : vector<8x128xf32>
    %118 = arith.negf %117 : vector<8x128xf32>
    %119 = math.exp %118 : vector<8x128xf32>
    %cst_28 = arith.constant 1.000000e+00 : f32
    %120 = vector.broadcast %cst_28 : f32 to vector<8x128xf32>
    %121 = arith.addf %120, %119 : vector<8x128xf32>
    %122 = arith.divf %120, %121 : vector<8x128xf32>
    %123 = vector.extract_strided_slice %122 {offsets = [0, 0], sizes = [8, 32], strides = [1, 1]} : vector<8x128xf32> to vector<8x32xf32>
    %124 = vector.extract_strided_slice %122 {offsets = [0, 32], sizes = [8, 32], strides = [1, 1]} : vector<8x128xf32> to vector<8x32xf32>
    %125 = vector.extract_strided_slice %122 {offsets = [0, 64], sizes = [8, 32], strides = [1, 1]} : vector<8x128xf32> to vector<8x32xf32>
    %cst_29 = arith.constant 2.000000e+00 : f32
    %126 = vector.broadcast %cst_29 : f32 to vector<8x32xf32>
    %127 = arith.mulf %126, %125 : vector<8x32xf32>
    %cst_30 = arith.constant 1.000000e+00 : f32
    %128 = vector.broadcast %cst_30 : f32 to vector<8x32xf32>
    %129 = arith.subf %127, %128 : vector<8x32xf32>
    %130 = vector.extract_strided_slice %122 {offsets = [0, 96], sizes = [8, 32], strides = [1, 1]} : vector<8x128xf32> to vector<8x32xf32>
    %131 = arith.mulf %124, %110 : vector<8x32xf32>
    %132 = arith.mulf %123, %129 : vector<8x32xf32>
    %133 = arith.addf %131, %132 : vector<8x32xf32>
    %134 = math.tanh %133 : vector<8x32xf32>
    %135 = arith.mulf %130, %134 : vector<8x32xf32>
    %136 = vector.extract_strided_slice %14 {offsets = [5, 0, 0], sizes = [1, 8, 128], strides = [1, 1, 1]} : vector<8x8x128xf32> to vector<1x8x128xf32>
    %137 = vector.shape_cast %136 : vector<1x8x128xf32> to vector<8x128xf32>
    %138 = arith.truncf %135 : vector<8x32xf32> to vector<8x32xbf16>
    %cst_31 = arith.constant dense<0.000000e+00> : vector<8x128xf32>
    %139 = tpu.matmul %138, %15, %cst_31 {dimension_numbers = #tpu.dot_dimension_numbers<[1], [0], [0], [1], [0, 0, 1, 1], [], []>} : vector<8x32xbf16>, vector<32x128xbf16>, vector<8x128xf32> -> vector<8x128xf32>
    %140 = arith.addf %137, %139 : vector<8x128xf32>
    %141 = arith.negf %140 : vector<8x128xf32>
    %142 = math.exp %141 : vector<8x128xf32>
    %cst_32 = arith.constant 1.000000e+00 : f32
    %143 = vector.broadcast %cst_32 : f32 to vector<8x128xf32>
    %144 = arith.addf %143, %142 : vector<8x128xf32>
    %145 = arith.divf %143, %144 : vector<8x128xf32>
    %146 = vector.extract_strided_slice %145 {offsets = [0, 0], sizes = [8, 32], strides = [1, 1]} : vector<8x128xf32> to vector<8x32xf32>
    %147 = vector.extract_strided_slice %145 {offsets = [0, 32], sizes = [8, 32], strides = [1, 1]} : vector<8x128xf32> to vector<8x32xf32>
    %148 = vector.extract_strided_slice %145 {offsets = [0, 64], sizes = [8, 32], strides = [1, 1]} : vector<8x128xf32> to vector<8x32xf32>
    %cst_33 = arith.constant 2.000000e+00 : f32
    %149 = vector.broadcast %cst_33 : f32 to vector<8x32xf32>
    %150 = arith.mulf %149, %148 : vector<8x32xf32>
    %cst_34 = arith.constant 1.000000e+00 : f32
    %151 = vector.broadcast %cst_34 : f32 to vector<8x32xf32>
    %152 = arith.subf %150, %151 : vector<8x32xf32>
    %153 = vector.extract_strided_slice %145 {offsets = [0, 96], sizes = [8, 32], strides = [1, 1]} : vector<8x128xf32> to vector<8x32xf32>
    %154 = arith.mulf %147, %133 : vector<8x32xf32>
    %155 = arith.mulf %146, %152 : vector<8x32xf32>
    %156 = arith.addf %154, %155 : vector<8x32xf32>
    %157 = math.tanh %156 : vector<8x32xf32>
    %158 = arith.mulf %153, %157 : vector<8x32xf32>
    %159 = vector.extract_strided_slice %14 {offsets = [6, 0, 0], sizes = [1, 8, 128], strides = [1, 1, 1]} : vector<8x8x128xf32> to vector<1x8x128xf32>
    %160 = vector.shape_cast %159 : vector<1x8x128xf32> to vector<8x128xf32>
    %161 = arith.truncf %158 : vector<8x32xf32> to vector<8x32xbf16>
    %cst_35 = arith.constant dense<0.000000e+00> : vector<8x128xf32>
    %162 = tpu.matmul %161, %15, %cst_35 {dimension_numbers = #tpu.dot_dimension_numbers<[1], [0], [0], [1], [0, 0, 1, 1], [], []>} : vector<8x32xbf16>, vector<32x128xbf16>, vector<8x128xf32> -> vector<8x128xf32>
    %163 = arith.addf %160, %162 : vector<8x128xf32>
    %164 = arith.negf %163 : vector<8x128xf32>
    %165 = math.exp %164 : vector<8x128xf32>
    %cst_36 = arith.constant 1.000000e+00 : f32
    %166 = vector.broadcast %cst_36 : f32 to vector<8x128xf32>
    %167 = arith.addf %166, %165 : vector<8x128xf32>
    %168 = arith.divf %166, %167 : vector<8x128xf32>
    %169 = vector.extract_strided_slice %168 {offsets = [0, 0], sizes = [8, 32], strides = [1, 1]} : vector<8x128xf32> to vector<8x32xf32>
    %170 = vector.extract_strided_slice %168 {offsets = [0, 32], sizes = [8, 32], strides = [1, 1]} : vector<8x128xf32> to vector<8x32xf32>
    %171 = vector.extract_strided_slice %168 {offsets = [0, 64], sizes = [8, 32], strides = [1, 1]} : vector<8x128xf32> to vector<8x32xf32>
    %cst_37 = arith.constant 2.000000e+00 : f32
    %172 = vector.broadcast %cst_37 : f32 to vector<8x32xf32>
    %173 = arith.mulf %172, %171 : vector<8x32xf32>
    %cst_38 = arith.constant 1.000000e+00 : f32
    %174 = vector.broadcast %cst_38 : f32 to vector<8x32xf32>
    %175 = arith.subf %173, %174 : vector<8x32xf32>
    %176 = vector.extract_strided_slice %168 {offsets = [0, 96], sizes = [8, 32], strides = [1, 1]} : vector<8x128xf32> to vector<8x32xf32>
    %177 = arith.mulf %170, %156 : vector<8x32xf32>
    %178 = arith.mulf %169, %175 : vector<8x32xf32>
    %179 = arith.addf %177, %178 : vector<8x32xf32>
    %180 = math.tanh %179 : vector<8x32xf32>
    %181 = arith.mulf %176, %180 : vector<8x32xf32>
    %182 = vector.extract_strided_slice %14 {offsets = [7, 0, 0], sizes = [1, 8, 128], strides = [1, 1, 1]} : vector<8x8x128xf32> to vector<1x8x128xf32>
    %183 = vector.shape_cast %182 : vector<1x8x128xf32> to vector<8x128xf32>
    %184 = arith.truncf %181 : vector<8x32xf32> to vector<8x32xbf16>
    %cst_39 = arith.constant dense<0.000000e+00> : vector<8x128xf32>
    %185 = tpu.matmul %184, %15, %cst_39 {dimension_numbers = #tpu.dot_dimension_numbers<[1], [0], [0], [1], [0, 0, 1, 1], [], []>} : vector<8x32xbf16>, vector<32x128xbf16>, vector<8x128xf32> -> vector<8x128xf32>
    %186 = arith.addf %183, %185 : vector<8x128xf32>
    %187 = arith.negf %186 : vector<8x128xf32>
    %188 = math.exp %187 : vector<8x128xf32>
    %cst_40 = arith.constant 1.000000e+00 : f32
    %189 = vector.broadcast %cst_40 : f32 to vector<8x128xf32>
    %190 = arith.addf %189, %188 : vector<8x128xf32>
    %191 = arith.divf %189, %190 : vector<8x128xf32>
    %192 = vector.extract_strided_slice %191 {offsets = [0, 0], sizes = [8, 32], strides = [1, 1]} : vector<8x128xf32> to vector<8x32xf32>
    %193 = vector.extract_strided_slice %191 {offsets = [0, 32], sizes = [8, 32], strides = [1, 1]} : vector<8x128xf32> to vector<8x32xf32>
    %194 = vector.extract_strided_slice %191 {offsets = [0, 64], sizes = [8, 32], strides = [1, 1]} : vector<8x128xf32> to vector<8x32xf32>
    %cst_41 = arith.constant 2.000000e+00 : f32
    %195 = vector.broadcast %cst_41 : f32 to vector<8x32xf32>
    %196 = arith.mulf %195, %194 : vector<8x32xf32>
    %cst_42 = arith.constant 1.000000e+00 : f32
    %197 = vector.broadcast %cst_42 : f32 to vector<8x32xf32>
    %198 = arith.subf %196, %197 : vector<8x32xf32>
    %199 = vector.extract_strided_slice %191 {offsets = [0, 96], sizes = [8, 32], strides = [1, 1]} : vector<8x128xf32> to vector<8x32xf32>
    %200 = arith.mulf %193, %179 : vector<8x32xf32>
    %201 = arith.mulf %192, %198 : vector<8x32xf32>
    %202 = arith.addf %200, %201 : vector<8x32xf32>
    %203 = math.tanh %202 : vector<8x32xf32>
    %204 = arith.mulf %199, %203 : vector<8x32xf32>
    %c32 = arith.constant 32 : index
    %c0_43 = arith.constant 0 : index
    %205 = vector.load %arg2[%c32, %c0_43] : memref<352x128xbf16, #tpu.memory_space<vmem>>, vector<32x128xbf16>
    %c64 = arith.constant 64 : index
    %c0_44 = arith.constant 0 : index
    %206 = vector.load %arg2[%c64, %c0_44] : memref<352x128xbf16, #tpu.memory_space<vmem>>, vector<32x128xbf16>
    %c10 = arith.constant 10 : index
    %c0_45 = arith.constant 0 : index
    %207 = vector.load %arg1[%c10, %c0_45] : memref<12x128xf32, #tpu.memory_space<vmem>>, vector<1x128xf32>
    %208 = tpu.concatenate %43, %66, %89, %112, %135, %158, %181, %204 in 0 : vector<8x32xf32>, vector<8x32xf32>, vector<8x32xf32>, vector<8x32xf32>, vector<8x32xf32>, vector<8x32xf32>, vector<8x32xf32>, vector<8x32xf32> -> vector<64x32xf32>
    %209 = arith.truncf %208 : vector<64x32xf32> to vector<64x32xbf16>
    %cst_46 = arith.constant dense<0.000000e+00> : vector<64x128xf32>
    %210 = tpu.matmul %209, %205, %cst_46 {dimension_numbers = #tpu.dot_dimension_numbers<[1], [0], [0], [1], [0, 0, 1, 1], [], []>} : vector<64x32xbf16>, vector<32x128xbf16>, vector<64x128xf32> -> vector<64x128xf32>
    %211 = vector.broadcast %207 : vector<1x128xf32> to vector<64x128xf32>
    %212 = arith.addf %210, %211 : vector<64x128xf32>
    %cst_47 = arith.constant 0.000000e+00 : f32
    %213 = vector.broadcast %cst_47 : f32 to vector<8x32xf32>
    %cst_48 = arith.constant 0.000000e+00 : f32
    %214 = vector.broadcast %cst_48 : f32 to vector<8x32xf32>
    %215 = vector.extract_strided_slice %212 {offsets = [0, 0], sizes = [8, 128], strides = [1, 1]} : vector<64x128xf32> to vector<8x128xf32>
    %216 = arith.truncf %213 : vector<8x32xf32> to vector<8x32xbf16>
    %cst_49 = arith.constant dense<0.000000e+00> : vector<8x128xf32>
    %217 = tpu.matmul %216, %206, %cst_49 {dimension_numbers = #tpu.dot_dimension_numbers<[1], [0], [0], [1], [0, 0, 1, 1], [], []>} : vector<8x32xbf16>, vector<32x128xbf16>, vector<8x128xf32> -> vector<8x128xf32>
    %218 = arith.addf %215, %217 : vector<8x128xf32>
    %219 = arith.negf %218 : vector<8x128xf32>
    %220 = math.exp %219 : vector<8x128xf32>
    %cst_50 = arith.constant 1.000000e+00 : f32
    %221 = vector.broadcast %cst_50 : f32 to vector<8x128xf32>
    %222 = arith.addf %221, %220 : vector<8x128xf32>
    %223 = arith.divf %221, %222 : vector<8x128xf32>
    %224 = vector.extract_strided_slice %223 {offsets = [0, 0], sizes = [8, 32], strides = [1, 1]} : vector<8x128xf32> to vector<8x32xf32>
    %225 = vector.extract_strided_slice %223 {offsets = [0, 32], sizes = [8, 32], strides = [1, 1]} : vector<8x128xf32> to vector<8x32xf32>
    %226 = vector.extract_strided_slice %223 {offsets = [0, 64], sizes = [8, 32], strides = [1, 1]} : vector<8x128xf32> to vector<8x32xf32>
    %cst_51 = arith.constant 2.000000e+00 : f32
    %227 = vector.broadcast %cst_51 : f32 to vector<8x32xf32>
    %228 = arith.mulf %227, %226 : vector<8x32xf32>
    %cst_52 = arith.constant 1.000000e+00 : f32
    %229 = vector.broadcast %cst_52 : f32 to vector<8x32xf32>
    %230 = arith.subf %228, %229 : vector<8x32xf32>
    %231 = vector.extract_strided_slice %223 {offsets = [0, 96], sizes = [8, 32], strides = [1, 1]} : vector<8x128xf32> to vector<8x32xf32>
    %232 = arith.mulf %225, %214 : vector<8x32xf32>
    %233 = arith.mulf %224, %230 : vector<8x32xf32>
    %234 = arith.addf %232, %233 : vector<8x32xf32>
    %235 = math.tanh %234 : vector<8x32xf32>
    %236 = arith.mulf %231, %235 : vector<8x32xf32>
    %c96 = arith.constant 96 : index
    %c0_53 = arith.constant 0 : index
    %237 = vector.load %arg2[%c96, %c0_53] : memref<352x128xbf16, #tpu.memory_space<vmem>>, vector<32x128xbf16>
    %238 = arith.truncf %236 : vector<8x32xf32> to vector<8x32xbf16>
    %cst_54 = arith.constant dense<0.000000e+00> : vector<8x128xf32>
    %239 = tpu.matmul %238, %237, %cst_54 {dimension_numbers = #tpu.dot_dimension_numbers<[1], [0], [0], [1], [0, 0, 1, 1], [], []>} : vector<8x32xbf16>, vector<32x128xbf16>, vector<8x128xf32> -> vector<8x128xf32>
    %240 = arith.addf %18, %239 : vector<8x128xf32>
    %241 = vector.extract_strided_slice %212 {offsets = [8, 0], sizes = [8, 128], strides = [1, 1]} : vector<64x128xf32> to vector<8x128xf32>
    %242 = arith.truncf %236 : vector<8x32xf32> to vector<8x32xbf16>
    %cst_55 = arith.constant dense<0.000000e+00> : vector<8x128xf32>
    %243 = tpu.matmul %242, %206, %cst_55 {dimension_numbers = #tpu.dot_dimension_numbers<[1], [0], [0], [1], [0, 0, 1, 1], [], []>} : vector<8x32xbf16>, vector<32x128xbf16>, vector<8x128xf32> -> vector<8x128xf32>
    %244 = arith.addf %241, %243 : vector<8x128xf32>
    %245 = arith.negf %244 : vector<8x128xf32>
    %246 = math.exp %245 : vector<8x128xf32>
    %cst_56 = arith.constant 1.000000e+00 : f32
    %247 = vector.broadcast %cst_56 : f32 to vector<8x128xf32>
    %248 = arith.addf %247, %246 : vector<8x128xf32>
    %249 = arith.divf %247, %248 : vector<8x128xf32>
    %250 = vector.extract_strided_slice %249 {offsets = [0, 0], sizes = [8, 32], strides = [1, 1]} : vector<8x128xf32> to vector<8x32xf32>
    %251 = vector.extract_strided_slice %249 {offsets = [0, 32], sizes = [8, 32], strides = [1, 1]} : vector<8x128xf32> to vector<8x32xf32>
    %252 = vector.extract_strided_slice %249 {offsets = [0, 64], sizes = [8, 32], strides = [1, 1]} : vector<8x128xf32> to vector<8x32xf32>
    %cst_57 = arith.constant 2.000000e+00 : f32
    %253 = vector.broadcast %cst_57 : f32 to vector<8x32xf32>
    %254 = arith.mulf %253, %252 : vector<8x32xf32>
    %cst_58 = arith.constant 1.000000e+00 : f32
    %255 = vector.broadcast %cst_58 : f32 to vector<8x32xf32>
    %256 = arith.subf %254, %255 : vector<8x32xf32>
    %257 = vector.extract_strided_slice %249 {offsets = [0, 96], sizes = [8, 32], strides = [1, 1]} : vector<8x128xf32> to vector<8x32xf32>
    %258 = arith.mulf %251, %234 : vector<8x32xf32>
    %259 = arith.mulf %250, %256 : vector<8x32xf32>
    %260 = arith.addf %258, %259 : vector<8x32xf32>
    %261 = math.tanh %260 : vector<8x32xf32>
    %262 = arith.mulf %257, %261 : vector<8x32xf32>
    %c128 = arith.constant 128 : index
    %c0_59 = arith.constant 0 : index
    %263 = vector.load %arg2[%c128, %c0_59] : memref<352x128xbf16, #tpu.memory_space<vmem>>, vector<32x128xbf16>
    %264 = arith.truncf %262 : vector<8x32xf32> to vector<8x32xbf16>
    %cst_60 = arith.constant dense<0.000000e+00> : vector<8x128xf32>
    %265 = tpu.matmul %264, %263, %cst_60 {dimension_numbers = #tpu.dot_dimension_numbers<[1], [0], [0], [1], [0, 0, 1, 1], [], []>} : vector<8x32xbf16>, vector<32x128xbf16>, vector<8x128xf32> -> vector<8x128xf32>
    %266 = arith.addf %240, %265 : vector<8x128xf32>
    %267 = vector.extract_strided_slice %212 {offsets = [16, 0], sizes = [8, 128], strides = [1, 1]} : vector<64x128xf32> to vector<8x128xf32>
    %268 = arith.truncf %262 : vector<8x32xf32> to vector<8x32xbf16>
    %cst_61 = arith.constant dense<0.000000e+00> : vector<8x128xf32>
    %269 = tpu.matmul %268, %206, %cst_61 {dimension_numbers = #tpu.dot_dimension_numbers<[1], [0], [0], [1], [0, 0, 1, 1], [], []>} : vector<8x32xbf16>, vector<32x128xbf16>, vector<8x128xf32> -> vector<8x128xf32>
    %270 = arith.addf %267, %269 : vector<8x128xf32>
    %271 = arith.negf %270 : vector<8x128xf32>
    %272 = math.exp %271 : vector<8x128xf32>
    %cst_62 = arith.constant 1.000000e+00 : f32
    %273 = vector.broadcast %cst_62 : f32 to vector<8x128xf32>
    %274 = arith.addf %273, %272 : vector<8x128xf32>
    %275 = arith.divf %273, %274 : vector<8x128xf32>
    %276 = vector.extract_strided_slice %275 {offsets = [0, 0], sizes = [8, 32], strides = [1, 1]} : vector<8x128xf32> to vector<8x32xf32>
    %277 = vector.extract_strided_slice %275 {offsets = [0, 32], sizes = [8, 32], strides = [1, 1]} : vector<8x128xf32> to vector<8x32xf32>
    %278 = vector.extract_strided_slice %275 {offsets = [0, 64], sizes = [8, 32], strides = [1, 1]} : vector<8x128xf32> to vector<8x32xf32>
    %cst_63 = arith.constant 2.000000e+00 : f32
    %279 = vector.broadcast %cst_63 : f32 to vector<8x32xf32>
    %280 = arith.mulf %279, %278 : vector<8x32xf32>
    %cst_64 = arith.constant 1.000000e+00 : f32
    %281 = vector.broadcast %cst_64 : f32 to vector<8x32xf32>
    %282 = arith.subf %280, %281 : vector<8x32xf32>
    %283 = vector.extract_strided_slice %275 {offsets = [0, 96], sizes = [8, 32], strides = [1, 1]} : vector<8x128xf32> to vector<8x32xf32>
    %284 = arith.mulf %277, %260 : vector<8x32xf32>
    %285 = arith.mulf %276, %282 : vector<8x32xf32>
    %286 = arith.addf %284, %285 : vector<8x32xf32>
    %287 = math.tanh %286 : vector<8x32xf32>
    %288 = arith.mulf %283, %287 : vector<8x32xf32>
    %c160 = arith.constant 160 : index
    %c0_65 = arith.constant 0 : index
    %289 = vector.load %arg2[%c160, %c0_65] : memref<352x128xbf16, #tpu.memory_space<vmem>>, vector<32x128xbf16>
    %290 = arith.truncf %288 : vector<8x32xf32> to vector<8x32xbf16>
    %cst_66 = arith.constant dense<0.000000e+00> : vector<8x128xf32>
    %291 = tpu.matmul %290, %289, %cst_66 {dimension_numbers = #tpu.dot_dimension_numbers<[1], [0], [0], [1], [0, 0, 1, 1], [], []>} : vector<8x32xbf16>, vector<32x128xbf16>, vector<8x128xf32> -> vector<8x128xf32>
    %292 = arith.addf %266, %291 : vector<8x128xf32>
    %293 = vector.extract_strided_slice %212 {offsets = [24, 0], sizes = [8, 128], strides = [1, 1]} : vector<64x128xf32> to vector<8x128xf32>
    %294 = arith.truncf %288 : vector<8x32xf32> to vector<8x32xbf16>
    %cst_67 = arith.constant dense<0.000000e+00> : vector<8x128xf32>
    %295 = tpu.matmul %294, %206, %cst_67 {dimension_numbers = #tpu.dot_dimension_numbers<[1], [0], [0], [1], [0, 0, 1, 1], [], []>} : vector<8x32xbf16>, vector<32x128xbf16>, vector<8x128xf32> -> vector<8x128xf32>
    %296 = arith.addf %293, %295 : vector<8x128xf32>
    %297 = arith.negf %296 : vector<8x128xf32>
    %298 = math.exp %297 : vector<8x128xf32>
    %cst_68 = arith.constant 1.000000e+00 : f32
    %299 = vector.broadcast %cst_68 : f32 to vector<8x128xf32>
    %300 = arith.addf %299, %298 : vector<8x128xf32>
    %301 = arith.divf %299, %300 : vector<8x128xf32>
    %302 = vector.extract_strided_slice %301 {offsets = [0, 0], sizes = [8, 32], strides = [1, 1]} : vector<8x128xf32> to vector<8x32xf32>
    %303 = vector.extract_strided_slice %301 {offsets = [0, 32], sizes = [8, 32], strides = [1, 1]} : vector<8x128xf32> to vector<8x32xf32>
    %304 = vector.extract_strided_slice %301 {offsets = [0, 64], sizes = [8, 32], strides = [1, 1]} : vector<8x128xf32> to vector<8x32xf32>
    %cst_69 = arith.constant 2.000000e+00 : f32
    %305 = vector.broadcast %cst_69 : f32 to vector<8x32xf32>
    %306 = arith.mulf %305, %304 : vector<8x32xf32>
    %cst_70 = arith.constant 1.000000e+00 : f32
    %307 = vector.broadcast %cst_70 : f32 to vector<8x32xf32>
    %308 = arith.subf %306, %307 : vector<8x32xf32>
    %309 = vector.extract_strided_slice %301 {offsets = [0, 96], sizes = [8, 32], strides = [1, 1]} : vector<8x128xf32> to vector<8x32xf32>
    %310 = arith.mulf %303, %286 : vector<8x32xf32>
    %311 = arith.mulf %302, %308 : vector<8x32xf32>
    %312 = arith.addf %310, %311 : vector<8x32xf32>
    %313 = math.tanh %312 : vector<8x32xf32>
    %314 = arith.mulf %309, %313 : vector<8x32xf32>
    %c192 = arith.constant 192 : index
    %c0_71 = arith.constant 0 : index
    %315 = vector.load %arg2[%c192, %c0_71] : memref<352x128xbf16, #tpu.memory_space<vmem>>, vector<32x128xbf16>
    %316 = arith.truncf %314 : vector<8x32xf32> to vector<8x32xbf16>
    %cst_72 = arith.constant dense<0.000000e+00> : vector<8x128xf32>
    %317 = tpu.matmul %316, %315, %cst_72 {dimension_numbers = #tpu.dot_dimension_numbers<[1], [0], [0], [1], [0, 0, 1, 1], [], []>} : vector<8x32xbf16>, vector<32x128xbf16>, vector<8x128xf32> -> vector<8x128xf32>
    %318 = arith.addf %292, %317 : vector<8x128xf32>
    %319 = vector.extract_strided_slice %212 {offsets = [32, 0], sizes = [8, 128], strides = [1, 1]} : vector<64x128xf32> to vector<8x128xf32>
    %320 = arith.truncf %314 : vector<8x32xf32> to vector<8x32xbf16>
    %cst_73 = arith.constant dense<0.000000e+00> : vector<8x128xf32>
    %321 = tpu.matmul %320, %206, %cst_73 {dimension_numbers = #tpu.dot_dimension_numbers<[1], [0], [0], [1], [0, 0, 1, 1], [], []>} : vector<8x32xbf16>, vector<32x128xbf16>, vector<8x128xf32> -> vector<8x128xf32>
    %322 = arith.addf %319, %321 : vector<8x128xf32>
    %323 = arith.negf %322 : vector<8x128xf32>
    %324 = math.exp %323 : vector<8x128xf32>
    %cst_74 = arith.constant 1.000000e+00 : f32
    %325 = vector.broadcast %cst_74 : f32 to vector<8x128xf32>
    %326 = arith.addf %325, %324 : vector<8x128xf32>
    %327 = arith.divf %325, %326 : vector<8x128xf32>
    %328 = vector.extract_strided_slice %327 {offsets = [0, 0], sizes = [8, 32], strides = [1, 1]} : vector<8x128xf32> to vector<8x32xf32>
    %329 = vector.extract_strided_slice %327 {offsets = [0, 32], sizes = [8, 32], strides = [1, 1]} : vector<8x128xf32> to vector<8x32xf32>
    %330 = vector.extract_strided_slice %327 {offsets = [0, 64], sizes = [8, 32], strides = [1, 1]} : vector<8x128xf32> to vector<8x32xf32>
    %cst_75 = arith.constant 2.000000e+00 : f32
    %331 = vector.broadcast %cst_75 : f32 to vector<8x32xf32>
    %332 = arith.mulf %331, %330 : vector<8x32xf32>
    %cst_76 = arith.constant 1.000000e+00 : f32
    %333 = vector.broadcast %cst_76 : f32 to vector<8x32xf32>
    %334 = arith.subf %332, %333 : vector<8x32xf32>
    %335 = vector.extract_strided_slice %327 {offsets = [0, 96], sizes = [8, 32], strides = [1, 1]} : vector<8x128xf32> to vector<8x32xf32>
    %336 = arith.mulf %329, %312 : vector<8x32xf32>
    %337 = arith.mulf %328, %334 : vector<8x32xf32>
    %338 = arith.addf %336, %337 : vector<8x32xf32>
    %339 = math.tanh %338 : vector<8x32xf32>
    %340 = arith.mulf %335, %339 : vector<8x32xf32>
    %c224 = arith.constant 224 : index
    %c0_77 = arith.constant 0 : index
    %341 = vector.load %arg2[%c224, %c0_77] : memref<352x128xbf16, #tpu.memory_space<vmem>>, vector<32x128xbf16>
    %342 = arith.truncf %340 : vector<8x32xf32> to vector<8x32xbf16>
    %cst_78 = arith.constant dense<0.000000e+00> : vector<8x128xf32>
    %343 = tpu.matmul %342, %341, %cst_78 {dimension_numbers = #tpu.dot_dimension_numbers<[1], [0], [0], [1], [0, 0, 1, 1], [], []>} : vector<8x32xbf16>, vector<32x128xbf16>, vector<8x128xf32> -> vector<8x128xf32>
    %344 = arith.addf %318, %343 : vector<8x128xf32>
    %345 = vector.extract_strided_slice %212 {offsets = [40, 0], sizes = [8, 128], strides = [1, 1]} : vector<64x128xf32> to vector<8x128xf32>
    %346 = arith.truncf %340 : vector<8x32xf32> to vector<8x32xbf16>
    %cst_79 = arith.constant dense<0.000000e+00> : vector<8x128xf32>
    %347 = tpu.matmul %346, %206, %cst_79 {dimension_numbers = #tpu.dot_dimension_numbers<[1], [0], [0], [1], [0, 0, 1, 1], [], []>} : vector<8x32xbf16>, vector<32x128xbf16>, vector<8x128xf32> -> vector<8x128xf32>
    %348 = arith.addf %345, %347 : vector<8x128xf32>
    %349 = arith.negf %348 : vector<8x128xf32>
    %350 = math.exp %349 : vector<8x128xf32>
    %cst_80 = arith.constant 1.000000e+00 : f32
    %351 = vector.broadcast %cst_80 : f32 to vector<8x128xf32>
    %352 = arith.addf %351, %350 : vector<8x128xf32>
    %353 = arith.divf %351, %352 : vector<8x128xf32>
    %354 = vector.extract_strided_slice %353 {offsets = [0, 0], sizes = [8, 32], strides = [1, 1]} : vector<8x128xf32> to vector<8x32xf32>
    %355 = vector.extract_strided_slice %353 {offsets = [0, 32], sizes = [8, 32], strides = [1, 1]} : vector<8x128xf32> to vector<8x32xf32>
    %356 = vector.extract_strided_slice %353 {offsets = [0, 64], sizes = [8, 32], strides = [1, 1]} : vector<8x128xf32> to vector<8x32xf32>
    %cst_81 = arith.constant 2.000000e+00 : f32
    %357 = vector.broadcast %cst_81 : f32 to vector<8x32xf32>
    %358 = arith.mulf %357, %356 : vector<8x32xf32>
    %cst_82 = arith.constant 1.000000e+00 : f32
    %359 = vector.broadcast %cst_82 : f32 to vector<8x32xf32>
    %360 = arith.subf %358, %359 : vector<8x32xf32>
    %361 = vector.extract_strided_slice %353 {offsets = [0, 96], sizes = [8, 32], strides = [1, 1]} : vector<8x128xf32> to vector<8x32xf32>
    %362 = arith.mulf %355, %338 : vector<8x32xf32>
    %363 = arith.mulf %354, %360 : vector<8x32xf32>
    %364 = arith.addf %362, %363 : vector<8x32xf32>
    %365 = math.tanh %364 : vector<8x32xf32>
    %366 = arith.mulf %361, %365 : vector<8x32xf32>
    %c256 = arith.constant 256 : index
    %c0_83 = arith.constant 0 : index
    %367 = vector.load %arg2[%c256, %c0_83] : memref<352x128xbf16, #tpu.memory_space<vmem>>, vector<32x128xbf16>
    %368 = arith.truncf %366 : vector<8x32xf32> to vector<8x32xbf16>
    %cst_84 = arith.constant dense<0.000000e+00> : vector<8x128xf32>
    %369 = tpu.matmul %368, %367, %cst_84 {dimension_numbers = #tpu.dot_dimension_numbers<[1], [0], [0], [1], [0, 0, 1, 1], [], []>} : vector<8x32xbf16>, vector<32x128xbf16>, vector<8x128xf32> -> vector<8x128xf32>
    %370 = arith.addf %344, %369 : vector<8x128xf32>
    %371 = vector.extract_strided_slice %212 {offsets = [48, 0], sizes = [8, 128], strides = [1, 1]} : vector<64x128xf32> to vector<8x128xf32>
    %372 = arith.truncf %366 : vector<8x32xf32> to vector<8x32xbf16>
    %cst_85 = arith.constant dense<0.000000e+00> : vector<8x128xf32>
    %373 = tpu.matmul %372, %206, %cst_85 {dimension_numbers = #tpu.dot_dimension_numbers<[1], [0], [0], [1], [0, 0, 1, 1], [], []>} : vector<8x32xbf16>, vector<32x128xbf16>, vector<8x128xf32> -> vector<8x128xf32>
    %374 = arith.addf %371, %373 : vector<8x128xf32>
    %375 = arith.negf %374 : vector<8x128xf32>
    %376 = math.exp %375 : vector<8x128xf32>
    %cst_86 = arith.constant 1.000000e+00 : f32
    %377 = vector.broadcast %cst_86 : f32 to vector<8x128xf32>
    %378 = arith.addf %377, %376 : vector<8x128xf32>
    %379 = arith.divf %377, %378 : vector<8x128xf32>
    %380 = vector.extract_strided_slice %379 {offsets = [0, 0], sizes = [8, 32], strides = [1, 1]} : vector<8x128xf32> to vector<8x32xf32>
    %381 = vector.extract_strided_slice %379 {offsets = [0, 32], sizes = [8, 32], strides = [1, 1]} : vector<8x128xf32> to vector<8x32xf32>
    %382 = vector.extract_strided_slice %379 {offsets = [0, 64], sizes = [8, 32], strides = [1, 1]} : vector<8x128xf32> to vector<8x32xf32>
    %cst_87 = arith.constant 2.000000e+00 : f32
    %383 = vector.broadcast %cst_87 : f32 to vector<8x32xf32>
    %384 = arith.mulf %383, %382 : vector<8x32xf32>
    %cst_88 = arith.constant 1.000000e+00 : f32
    %385 = vector.broadcast %cst_88 : f32 to vector<8x32xf32>
    %386 = arith.subf %384, %385 : vector<8x32xf32>
    %387 = vector.extract_strided_slice %379 {offsets = [0, 96], sizes = [8, 32], strides = [1, 1]} : vector<8x128xf32> to vector<8x32xf32>
    %388 = arith.mulf %381, %364 : vector<8x32xf32>
    %389 = arith.mulf %380, %386 : vector<8x32xf32>
    %390 = arith.addf %388, %389 : vector<8x32xf32>
    %391 = math.tanh %390 : vector<8x32xf32>
    %392 = arith.mulf %387, %391 : vector<8x32xf32>
    %c288 = arith.constant 288 : index
    %c0_89 = arith.constant 0 : index
    %393 = vector.load %arg2[%c288, %c0_89] : memref<352x128xbf16, #tpu.memory_space<vmem>>, vector<32x128xbf16>
    %394 = arith.truncf %392 : vector<8x32xf32> to vector<8x32xbf16>
    %cst_90 = arith.constant dense<0.000000e+00> : vector<8x128xf32>
    %395 = tpu.matmul %394, %393, %cst_90 {dimension_numbers = #tpu.dot_dimension_numbers<[1], [0], [0], [1], [0, 0, 1, 1], [], []>} : vector<8x32xbf16>, vector<32x128xbf16>, vector<8x128xf32> -> vector<8x128xf32>
    %396 = arith.addf %370, %395 : vector<8x128xf32>
    %397 = vector.extract_strided_slice %212 {offsets = [56, 0], sizes = [8, 128], strides = [1, 1]} : vector<64x128xf32> to vector<8x128xf32>
    %398 = arith.truncf %392 : vector<8x32xf32> to vector<8x32xbf16>
    %cst_91 = arith.constant dense<0.000000e+00> : vector<8x128xf32>
    %399 = tpu.matmul %398, %206, %cst_91 {dimension_numbers = #tpu.dot_dimension_numbers<[1], [0], [0], [1], [0, 0, 1, 1], [], []>} : vector<8x32xbf16>, vector<32x128xbf16>, vector<8x128xf32> -> vector<8x128xf32>
    %400 = arith.addf %397, %399 : vector<8x128xf32>
    %401 = arith.negf %400 : vector<8x128xf32>
    %402 = math.exp %401 : vector<8x128xf32>
    %cst_92 = arith.constant 1.000000e+00 : f32
    %403 = vector.broadcast %cst_92 : f32 to vector<8x128xf32>
    %404 = arith.addf %403, %402 : vector<8x128xf32>
    %405 = arith.divf %403, %404 : vector<8x128xf32>
    %406 = vector.extract_strided_slice %405 {offsets = [0, 0], sizes = [8, 32], strides = [1, 1]} : vector<8x128xf32> to vector<8x32xf32>
    %407 = vector.extract_strided_slice %405 {offsets = [0, 32], sizes = [8, 32], strides = [1, 1]} : vector<8x128xf32> to vector<8x32xf32>
    %408 = vector.extract_strided_slice %405 {offsets = [0, 64], sizes = [8, 32], strides = [1, 1]} : vector<8x128xf32> to vector<8x32xf32>
    %cst_93 = arith.constant 2.000000e+00 : f32
    %409 = vector.broadcast %cst_93 : f32 to vector<8x32xf32>
    %410 = arith.mulf %409, %408 : vector<8x32xf32>
    %cst_94 = arith.constant 1.000000e+00 : f32
    %411 = vector.broadcast %cst_94 : f32 to vector<8x32xf32>
    %412 = arith.subf %410, %411 : vector<8x32xf32>
    %413 = vector.extract_strided_slice %405 {offsets = [0, 96], sizes = [8, 32], strides = [1, 1]} : vector<8x128xf32> to vector<8x32xf32>
    %414 = arith.mulf %407, %390 : vector<8x32xf32>
    %415 = arith.mulf %406, %412 : vector<8x32xf32>
    %416 = arith.addf %414, %415 : vector<8x32xf32>
    %417 = math.tanh %416 : vector<8x32xf32>
    %418 = arith.mulf %413, %417 : vector<8x32xf32>
    %c320 = arith.constant 320 : index
    %c0_95 = arith.constant 0 : index
    %419 = vector.load %arg2[%c320, %c0_95] : memref<352x128xbf16, #tpu.memory_space<vmem>>, vector<32x128xbf16>
    %420 = arith.truncf %418 : vector<8x32xf32> to vector<8x32xbf16>
    %cst_96 = arith.constant dense<0.000000e+00> : vector<8x128xf32>
    %421 = tpu.matmul %420, %419, %cst_96 {dimension_numbers = #tpu.dot_dimension_numbers<[1], [0], [0], [1], [0, 0, 1, 1], [], []>} : vector<8x32xbf16>, vector<32x128xbf16>, vector<8x128xf32> -> vector<8x128xf32>
    %422 = arith.addf %396, %421 : vector<8x128xf32>
    %c0_97 = arith.constant 0 : index
    %c0_98 = arith.constant 0 : index
    %423 = vector.load %arg3[%c0_97, %c0_98] : memref<8x128xf32, #tpu.memory_space<vmem>>, vector<8x128xf32>
    tpu.vector_store %arg3[%c0_97, %c0_98], %422 {strides = array<i32>} : memref<8x128xf32, #tpu.memory_space<vmem>>, vector<8x128xf32>,
    return
  }
}

</mosaic_0001>

<bundles_post_ra>
// kernel: cnn_lstm_forward.1
= control target key start
LH: loop header
LB: loop body
LE: loop exit
PB: predicated region body
PF: predicated region fallthrough
CT: control target
= control target key end

     0   :  { %8 = vsyncpa [#allocation3], 0  ;;  %s2533_s12 = smov [#allocation2]   ;;  %s2941_s0 = inlined_call_operand.vmem [shape: f32[13,8], index: 0, kind: input, shape index: {}]   ;;  %s2942_s1 = inlined_call_operand.vmem [shape: f32[12,128], index: 1, kind: input, shape index: {}]   ;;  %s2943_s2 = inlined_call_operand.hbm [shape: bf16[352,128], index: 2, kind: input, shape index: {}]   ;;  %s2944_s3 = inlined_call_operand.vmem [shape: f32[8,128], index: 3, kind: output, shape index: {}]  }
   0x1   :  { %s18_s13 = sshll.u32 %s2533_s12, 4  ;;  %s2509_s16 = scalar_lea.hbm %s2943_s2, 2816  ;;  %s19_s13 = int_to_ptr.vmem [resolvable:$true] %s18_s13 }
   0x2   :  { %p2510_p0 = scmp.ne.s32.totalorder %s2943_s2, %s2509_s16  ;;  %p2513_p1 = scmp.lt.u32.totalorder %s2509_s16, %s2943_s2 }
   0x4   :  { %p2515_p2 = pnand %p2513_p1, %p2510_p0 }
   0x6   :  { %2518 = shalt.err (!%p2515_p2)
}
   0x7   :  { %s2519_s21 = scalar_lea.vmem %s19_s13, 2816  ;;  %p2524_p4 = scmp.lt.s32.totalorder %s19_s13, %s19_s13 }
   0x8   :  { %p2520_p3 = scmp.ne.s32.totalorder %s19_s13, %s2519_s21  ;;  %p2525_p5 = scmp.lt.s32.totalorder %s2519_s21, %s2519_s21 }
   0xa   :  { %p2526_p6 = por %p2525_p5, %p2524_p4 }
   0xc   :  { %p2527_p7 = pnand %p2526_p6, %p2520_p3 }
   0xe   :  { %2530 = shalt.err (!%p2527_p7)
}
   0xf   :  { %s2534_s22 = smov 64   ;;  %s2535_s23 = smov 4  }
  0x10   :  { %24 = dma.hbm_to_vmem [thread:$0]  %s2943_s2, 2816, %s19_s13, [#allocation3], %s2534_s22, %s2534_s22, %s2535_s23  }
  0x11   :  { %2531 = dma.done.wait [#allocation3], 2816  }
  0x12   :  { %2532 = vsyncadd [#allocation3], 4294964480  ;;  %v2536_v0 = vmov 0.0|0.0   ;;  %vm2537_vm0 = vmmov 0   ;;  %v2538_v1 = vmov 0.0   ;;  %vm36_vm1 = vcmask 1044480  }
  0x13   :  { %2349 = vmatprep.subr.bf16.mxu0 %v2536_v0  ;;  %2142 = vmatprep.mubr.msk.f32.mxu0 %vm2537_vm0, %v2538_v1  ;;  %v30_v2 = vld [vmem:[%s2941_s0] sm:$0xff]  ;;  %v31_v3 = vld [vmem:[%s2941_s0 + $0x8] sm:$0x1f]  ;;  %vm2539_vm2 = vmmov 1   ;;  %vm32_vm4 = vcmask 105472   ;;  %v2540_v8 = vmov 0   ;;  %v113_v9 = vlaneseq }
  0x14   :  { %2145 = vmatprep.subr.bf16.mxu1 %v2538_v1  ;;  %2149 = vmatprep.mubr.msk.bf16.mxu1 %vm2537_vm0, %v2538_v1  ;;  %vm2351_vm3 = vmpackc.low %vm36_vm1, %vm2539_vm2  ;;  %v2350_v4 = vpack.c.bf16 %v31_v3, %v30_v2  ;;  %v29_v5 = vld [vmem:[%s2942_s1] sm:$0xff]  ;;  %v2592_v7 = vld [vmem:[#allocation2 + $0x8] sm:$0xff]   ;;  %s2541_s7 = smov 32   ;;  %vm214_vm5 = vcmask 261120  }
  0x15   :  { %v2590_v6 = vld [vmem:[#allocation2] sm:$0xff]   ;;  %v114_v10 = vshrl.u32 %v113_v9, 7  ;;  %v2627_v34 = vld [vmem:[%s2942_s1 + $0x8] ss:$0 sm:$0xff]  ;;  %v2632_v36 = vld [vmem:[%s2942_s1 + $0x9] ss:$0 sm:$0xff] }
  0x16   :  { %2352 = vmatpush3.bf16.msk.msra.mxu0 %vm2351_vm3, %v2350_v4  ;;  %2146 = vmatpush3.bf16.msra.mxu1 %v2590_v6 }
  0x17   :  { %2147 = vmatprep.subr.bf16.mxu1 %v2538_v1  ;;  %2153 = vmatprep.subr.bf16.mxu0 %v2538_v1  ;;  %v115_v11 = vsub.s32 0, %v114_v10  ;;  %v122_v12 = vsub.s32 1, %v114_v10  ;;  %v129_v13 = vsub.s32 2, %v114_v10  ;;  %v136_v14 = vsub.s32 3, %v114_v10 }
  0x18   :  { %v143_v16 = vsub.s32 4, %v114_v10  ;;  %v150_v17 = vsub.s32 5, %v114_v10  ;;  %v157_v18 = vsub.s32 6, %v114_v10  ;;  %v164_v19 = vsub.s32 7, %v114_v10 }
  0x19   :  { %2143 = vmatmul.mubr.msk.f32.vlgmr.msra.gmra.mrb[0].mxu0 %vm32_vm4, %v29_v5 }
  0x1a   :  { %2148 = vmatpush3.bf16.msra.mxu1 %v2592_v7  ;;  %2154 = vmatpush3.bf16.msra.mxu0 %v2590_v6 }
  0x1b   :  { %2155 = vmatprep.subr.bf16.mxu0 %v2538_v1  ;;  %2157 = vmatprep.mubr.msk.bf16.mxu0 %vm2537_vm0, %v2538_v1 }
  0x1c   :  { %2161 = vmatprep.subr.bf16.mxu1 %v2538_v1 }
  0x1d   :  { %2150 = vmatmul.mubr.bf16.vlgmr.msra.gmra.mrb[0].mxu1 %v2540_v8 }
  0x1e   :  { %2156 = vmatpush3.bf16.msra.mxu0 %v2592_v7  ;;  %2162 = vmatpush3.bf16.msra.mxu1 %v2590_v6 }
  0x1f   :  { %2163 = vmatprep.subr.bf16.mxu1 %v2538_v1  ;;  %2165 = vmatprep.mubr.msk.bf16.mxu1 %vm2537_vm0, %v2538_v1 }
  0x20   :  { %2169 = vmatprep.subr.bf16.mxu0 %v2538_v1 }
  0x22   :  { %2164 = vmatpush3.bf16.msra.mxu1 %v2592_v7 }
  0x23   :  { %2177 = vmatprep.subr.bf16.mxu1 %v2538_v1 }
  0xec   :  { %v106_v15 = vpop.f32.mrb[0].mxu0 }
  0xed   :  { %v110_v20 = vmax.f32 %v106_v15, 0.0  ;;  %v2144_v21 = vpop.f32.mrb[1].mxu0 }
  0xef   :  { %v116_v22 = vrot.slane %v110_v20, %v115_v11  ;;  %v123_v23 = vrot.slane %v110_v20, %v122_v12  ;;  %v2612_v24 = vrot.slane %v110_v20, %v129_v13  ;;  %v2614_v25 = vrot.slane %v110_v20, %v136_v14 }
  0xf0   :  { %v252_v26 = vpop.f32.mrb[0].mxu1  ;;  %v2616_v27 = vrot.slane %v110_v20, %v143_v16  ;;  %v2618_v28 = vrot.slane %v110_v20, %v150_v17  ;;  %v2620_v29 = vrot.slane %v110_v20, %v157_v18  ;;  %v2622_v30 = vrot.slane %v110_v20, %v164_v19 }
  0xf1   :  { %118 = vbcast.lane.b32.xlu0 %v116_v22, 256  ;;  %v2151_v31 = vpop.f32.mrb[1].mxu1 }
  0xf2   :  { %v255_v32 = vpop.f32.mrb[2].mxu1 }
  0xf3   :  { %v2152_v33 = vpop.f32.mrb[3].mxu1 }
 0x163   :  { %v119_v35 = vpop.permute.xlu0 %118 }
 0x164   :  { %v173_v37 = vmul.f32 %v2627_v34, %v119_v35 }
 0x166   :  { %v185_v38 = vadd.f32 %v2632_v36, %v173_v37 }
 0x168   :  { %v258_v39 = vadd.f32 %v252_v26, %v185_v38 }
 0x16a   :  { %v1978_v40 = vmul.f32 -1.442695, %v258_v39 }
 0x16c   :  { %2413 = vpow2.f32 %v1978_v40 }
 0x176   :  { %v2414_v41 = vpop.eup %2413 }
 0x177   :  { %v262_v42 = vadd.f32 1.0, %v2414_v41 }
 0x179   :  { %2415 = vrcp.f32 %v262_v42 }
 0x183   :  { %v2416_v43 = vpop.eup %2415 }
 0x184   :  { %v265_v44 = vmul.f32 2.0, %v2416_v43  ;;  %v267_v48 = vmul.f32 0.0, %v2416_v43 }
 0x186   :  { %v1979_v45 = vadd.f32 -1.0, %v265_v44 }
 0x188   :  { %269 = vrot.lane.b32.xlu0 %v1979_v45, %s2534_s22 }
 0x1fa   :  { %v270_v46 = vpop.permute.xlu0 %269 }
 0x1fb   :  { %v272_v47 = vmul.f32 %v2416_v43, %v270_v46 }
 0x1fd   :  { %274 = vrot.lane.b32.xlu1 %v272_v47, %s2541_s7 }
 0x26f   :  { %v275_v49 = vpop.permute.xlu1 %274 }
 0x270   :  { %v277_v50 = vadd.f32 %v275_v49, %v267_v48 }
 0x272   :  { %2417 = vtanh.f32 %v277_v50 }
 0x27c   :  { %v2418_v51 = vpop.eup %2417 }
 0x27d   :  { %280 = vrot.lane.b32.xlu1 %v2418_v51, %s2534_s22 }
 0x281   :  { %125 = vbcast.lane.b32.xlu1 %v123_v23, 256 }
 0x2ef   :  { %v281_v52 = vpop.permute.xlu1 %280 }
 0x2f0   :  { %v2639_v53 = vmul.f32 %v2416_v43, %v281_v52 }
 0x2f2   :  { %v284_v54 = vpack.c.bf16 %v2639_v53, %v2639_v53 }
 0x2f3   :  { %v126_v56 = vpop.permute.xlu1 %125 }
 0x2f4   :  { %286 = vrot.lane.b32.xlu0 %v284_v54, %s2541_s7  ;;  %v174_v57 = vmul.f32 %v2627_v34, %v126_v56 }
 0x2f6   :  { %v186_v58 = vadd.f32 %v2632_v36, %v174_v57 }
 0x366   :  { %v287_v55 = vpop.permute.xlu0 %286 }
 0x367   :  { %2158 = vmatmul.mubr.msk.bf16.vlgmr.msra.gmra.mrb[4].mxu0 %vm214_vm5, %v287_v55 }
 0x368   :  { %2170 = vmatpush3.bf16.msra.mxu0 %v2590_v6  ;;  %2173 = vmatprep.mubr.msk.bf16.mxu0 %vm2537_vm0, %v2538_v1 }
 0x369   :  { %2171 = vmatprep.subr.bf16.mxu0 %v2538_v1 }
 0x36c   :  { %2172 = vmatpush3.bf16.msra.mxu0 %v2592_v7 }
 0x36d   :  { %2185 = vmatprep.subr.bf16.mxu0 %v2538_v1 }
 0x43a   :  { %v325_v59 = vpop.f32.mrb[4].mxu0 }
 0x43b   :  { %v331_v60 = vadd.f32 %v325_v59, %v186_v58  ;;  %v2159_v61 = vpop.f32.mrb[5].mxu0 }
 0x43c   :  { %v328_v62 = vpop.f32.mrb[6].mxu0 }
 0x43d   :  { %v1981_v63 = vmul.f32 -1.442695, %v331_v60  ;;  %v2160_v0 = vpop.f32.mrb[7].mxu0 }
 0x43f   :  { %2419 = vpow2.f32 %v1981_v63 }
 0x449   :  { %v2420_v2 = vpop.eup %2419 }
 0x44a   :  { %v335_v3 = vadd.f32 1.0, %v2420_v2 }
 0x44c   :  { %2421 = vrcp.f32 %v335_v3 }
 0x456   :  { %v2422_v4 = vpop.eup %2421 }
 0x457   :  { %v338_v5 = vmul.f32 2.0, %v2422_v4  ;;  %v340_v12 = vmul.f32 %v2422_v4, %v277_v50 }
 0x459   :  { %v1982_v9 = vadd.f32 -1.0, %v338_v5 }
 0x45b   :  { %342 = vrot.lane.b32.xlu0 %v1982_v9, %s2534_s22 }
 0x4cd   :  { %v343_v10 = vpop.permute.xlu0 %342 }
 0x4ce   :  { %v345_v11 = vmul.f32 %v2422_v4, %v343_v10 }
 0x4d0   :  { %347 = vrot.lane.b32.xlu1 %v345_v11, %s2541_s7 }
 0x542   :  { %v348_v13 = vpop.permute.xlu1 %347 }
 0x543   :  { %v350_v14 = vadd.f32 %v348_v13, %v340_v12 }
 0x545   :  { %2423 = vtanh.f32 %v350_v14 }
 0x54f   :  { %v2424_v15 = vpop.eup %2423 }
 0x550   :  { %353 = vrot.lane.b32.xlu0 %v2424_v15, %s2534_s22 }
 0x554   :  { %132 = vbcast.lane.b32.xlu0 %v2612_v24, 256 }
 0x5c2   :  { %v354_v16 = vpop.permute.xlu0 %353 }
 0x5c3   :  { %v2657_v17 = vmul.f32 %v2422_v4, %v354_v16 }
 0x5c5   :  { %v357_v18 = vpack.c.bf16 %v2657_v17, %v2657_v17 }
 0x5c6   :  { %v133_v20 = vpop.permute.xlu0 %132 }
 0x5c7   :  { %359 = vrot.lane.b32.xlu1 %v357_v18, %s2541_s7  ;;  %v175_v21 = vmul.f32 %v2627_v34, %v133_v20 }
 0x5c9   :  { %v187_v22 = vadd.f32 %v2632_v36, %v175_v21 }
 0x639   :  { %v360_v19 = vpop.permute.xlu1 %359 }
 0x63a   :  { %2166 = vmatmul.mubr.msk.bf16.vlgmr.msra.gmra.mrb[4].mxu1 %vm214_vm5, %v360_v19 }
 0x63b   :  { %2178 = vmatpush3.bf16.msra.mxu1 %v2590_v6  ;;  %2181 = vmatprep.mubr.msk.bf16.mxu1 %vm2537_vm0, %v2538_v1 }
 0x63c   :  { %2179 = vmatprep.subr.bf16.mxu1 %v2538_v1 }
 0x63f   :  { %2180 = vmatpush3.bf16.msra.mxu1 %v2592_v7 }
 0x640   :  { %2193 = vmatprep.subr.bf16.mxu1 %v2538_v1 }
 0x70d   :  { %v398_v23 = vpop.f32.mrb[4].mxu1 }
 0x70e   :  { %v404_v24 = vadd.f32 %v398_v23, %v187_v22  ;;  %v2167_v26 = vpop.f32.mrb[5].mxu1 }
 0x70f   :  { %v401_v31 = vpop.f32.mrb[6].mxu1 }
 0x710   :  { %v1984_v32 = vmul.f32 -1.442695, %v404_v24  ;;  %v2168_v33 = vpop.f32.mrb[7].mxu1 }
 0x712   :  { %2425 = vpow2.f32 %v1984_v32 }
 0x71c   :  { %v2426_v35 = vpop.eup %2425 }
 0x71d   :  { %v408_v37 = vadd.f32 1.0, %v2426_v35 }
 0x71f   :  { %2427 = vrcp.f32 %v408_v37 }
 0x729   :  { %v2428_v38 = vpop.eup %2427 }
 0x72a   :  { %v411_v39 = vmul.f32 2.0, %v2428_v38  ;;  %v413_v43 = vmul.f32 %v2428_v38, %v350_v14 }
 0x72c   :  { %v1985_v40 = vadd.f32 -1.0, %v411_v39 }
 0x72e   :  { %415 = vrot.lane.b32.xlu1 %v1985_v40, %s2534_s22 }
 0x7a0   :  { %v416_v41 = vpop.permute.xlu1 %415 }
 0x7a1   :  { %v418_v42 = vmul.f32 %v2428_v38, %v416_v41 }
 0x7a3   :  { %420 = vrot.lane.b32.xlu0 %v418_v42, %s2541_s7 }
 0x815   :  { %v421_v44 = vpop.permute.xlu0 %420 }
 0x816   :  { %v423_v45 = vadd.f32 %v421_v44, %v413_v43 }
 0x818   :  { %2429 = vtanh.f32 %v423_v45 }
 0x822   :  { %v2430_v46 = vpop.eup %2429 }
 0x823   :  { %426 = vrot.lane.b32.xlu1 %v2430_v46, %s2534_s22 }
 0x827   :  { %139 = vbcast.lane.b32.xlu1 %v2614_v25, 256 }
 0x895   :  { %v427_v47 = vpop.permute.xlu1 %426 }
 0x896   :  { %v2675_v48 = vmul.f32 %v2428_v38, %v427_v47 }
 0x898   :  { %v430_v49 = vpack.c.bf16 %v2675_v48, %v2675_v48 }
 0x899   :  { %v140_v25 = vpop.permute.xlu1 %139 }
 0x89a   :  { %432 = vrot.lane.b32.xlu0 %v430_v49, %s2541_s7  ;;  %v176_v51 = vmul.f32 %v2627_v34, %v140_v25 }
 0x89c   :  { %v188_v52 = vadd.f32 %v2632_v36, %v176_v51 }
 0x90c   :  { %v433_v50 = vpop.permute.xlu0 %432 }
 0x90d   :  { %2174 = vmatmul.mubr.msk.bf16.vlgmr.msra.gmra.mrb[8].mxu0 %vm214_vm5, %v433_v50 }
 0x90e   :  { %2186 = vmatpush3.bf16.msra.mxu0 %v2590_v6  ;;  %2189 = vmatprep.mubr.msk.bf16.mxu0 %vm2537_vm0, %v2538_v1 }
 0x90f   :  { %2187 = vmatprep.subr.bf16.mxu0 %v2538_v1 }
 0x912   :  { %2188 = vmatpush3.bf16.msra.mxu0 %v2592_v7 }
 0x913   :  { %2201 = vmatprep.subr.bf16.mxu0 %v2538_v1 }
 0x9e0   :  { %v471_v54 = vpop.f32.mrb[8].mxu0 }
 0x9e1   :  { %v477_v55 = vadd.f32 %v471_v54, %v188_v52  ;;  %v2175_v56 = vpop.f32.mrb[9].mxu0 }
 0x9e2   :  { %v474_v57 = vpop.f32.mrb[10].mxu0 }
 0x9e3   :  { %v1987_v58 = vmul.f32 -1.442695, %v477_v55  ;;  %v2176_v59 = vpop.f32.mrb[11].mxu0 }
 0x9e5   :  { %2431 = vpow2.f32 %v1987_v58 }
 0x9ef   :  { %v2432_v60 = vpop.eup %2431 }
 0x9f0   :  { %v481_v61 = vadd.f32 1.0, %v2432_v60 }
 0x9f2   :  { %2433 = vrcp.f32 %v481_v61 }
 0x9fc   :  { %v2434_v62 = vpop.eup %2433 }
 0x9fd   :  { %v484_v63 = vmul.f32 2.0, %v2434_v62  ;;  %v486_v4 = vmul.f32 %v2434_v62, %v423_v45 }
 0x9ff   :  { %v1988_v0 = vadd.f32 -1.0, %v484_v63 }
 0xa01   :  { %488 = vrot.lane.b32.xlu0 %v1988_v0, %s2534_s22 }
 0xa73   :  { %v489_v2 = vpop.permute.xlu0 %488 }
 0xa74   :  { %v491_v3 = vmul.f32 %v2434_v62, %v489_v2 }
 0xa76   :  { %493 = vrot.lane.b32.xlu1 %v491_v3, %s2541_s7 }
 0xae8   :  { %v494_v5 = vpop.permute.xlu1 %493 }
 0xae9   :  { %v496_v9 = vadd.f32 %v494_v5, %v486_v4 }
 0xaeb   :  { %2435 = vtanh.f32 %v496_v9 }
 0xaf5   :  { %v2436_v10 = vpop.eup %2435 }
 0xaf6   :  { %499 = vrot.lane.b32.xlu0 %v2436_v10, %s2534_s22 }
 0xafa   :  { %146 = vbcast.lane.b32.xlu0 %v2616_v27, 256 }
 0xb68   :  { %v500_v11 = vpop.permute.xlu0 %499 }
 0xb69   :  { %v2693_v12 = vmul.f32 %v2434_v62, %v500_v11 }
 0xb6b   :  { %v503_v13 = vpack.c.bf16 %v2693_v12, %v2693_v12 }
 0xb6c   :  { %v147_v27 = vpop.permute.xlu0 %146 }
 0xb6d   :  { %505 = vrot.lane.b32.xlu1 %v503_v13, %s2541_s7  ;;  %v177_v15 = vmul.f32 %v2627_v34, %v147_v27 }
 0xb6f   :  { %v189_v16 = vadd.f32 %v2632_v36, %v177_v15 }
 0xbdf   :  { %v506_v14 = vpop.permute.xlu1 %505 }
 0xbe0   :  { %2182 = vmatmul.mubr.msk.bf16.vlgmr.msra.gmra.mrb[8].mxu1 %vm214_vm5, %v506_v14 }
 0xbe1   :  { %2194 = vmatpush3.bf16.msra.mxu1 %v2590_v6  ;;  %2197 = vmatprep.mubr.msk.bf16.mxu1 %vm2537_vm0, %v2538_v1 }
 0xbe2   :  { %2195 = vmatprep.subr.bf16.mxu1 %v2538_v1 }
 0xbe5   :  { %2196 = vmatpush3.bf16.msra.mxu1 %v2592_v7 }
 0xcb3   :  { %v544_v18 = vpop.f32.mrb[8].mxu1 }
 0xcb4   :  { %v550_v19 = vadd.f32 %v544_v18, %v189_v16  ;;  %v2183_v20 = vpop.f32.mrb[9].mxu1 }
 0xcb5   :  { %v547_v21 = vpop.f32.mrb[10].mxu1 }
 0xcb6   :  { %v1990_v22 = vmul.f32 -1.442695, %v550_v19  ;;  %v2184_v23 = vpop.f32.mrb[11].mxu1 }
 0xcb8   :  { %2437 = vpow2.f32 %v1990_v22 }
 0xcc2   :  { %v2438_v24 = vpop.eup %2437 }
 0xcc3   :  { %v554_v26 = vadd.f32 1.0, %v2438_v24 }
 0xcc5   :  { %2439 = vrcp.f32 %v554_v26 }
 0xccf   :  { %v2440_v31 = vpop.eup %2439 }
 0xcd0   :  { %v557_v32 = vmul.f32 2.0, %v2440_v31  ;;  %v559_v38 = vmul.f32 %v2440_v31, %v496_v9 }
 0xcd2   :  { %v1991_v33 = vadd.f32 -1.0, %v557_v32  ;;  %v2393_v32 = vld [vmem:[#allocation2 + $0x10] sm:$0xff]  }
 0xcd3   :  { %2209 = vmatprep.subr.bf16.mxu1 %v2393_v32 }
 0xcd4   :  { %561 = vrot.lane.b32.xlu1 %v1991_v33, %s2534_s22 }
 0xd46   :  { %v562_v35 = vpop.permute.xlu1 %561 }
 0xd47   :  { %v564_v37 = vmul.f32 %v2440_v31, %v562_v35  ;;  %v804_v35 = vpack.c.bf16 %v2657_v17, %v2639_v53  ;;  %v805_v53 = vpack.c.bf16 %v2693_v12, %v2675_v48 }
 0xd49   :  { %566 = vrot.lane.b32.xlu0 %v564_v37, %s2541_s7  ;;  %v2394_v37 = vld [vmem:[#allocation2 + $0x18] sm:$0xff]  }
 0xdbb   :  { %v567_v39 = vpop.permute.xlu0 %566 }
 0xdbc   :  { %v569_v40 = vadd.f32 %v567_v39, %v559_v38 }
 0xdbe   :  { %2441 = vtanh.f32 %v569_v40 }
 0xdc8   :  { %v2442_v41 = vpop.eup %2441 }
 0xdc9   :  { %572 = vrot.lane.b32.xlu1 %v2442_v41, %s2534_s22 }
 0xdcd   :  { %153 = vbcast.lane.b32.xlu1 %v2618_v28, 256 }
 0xe3b   :  { %v573_v42 = vpop.permute.xlu1 %572 }
 0xe3c   :  { %v2710_v43 = vmul.f32 %v2440_v31, %v573_v42  ;;  %v2760_v42 = vld [vmem:[#allocation2 + $0x28] sm:$0xff]  }
 0xe3e   :  { %v576_v44 = vpack.c.bf16 %v2710_v43, %v2710_v43 }
 0xe3f   :  { %v154_v28 = vpop.permute.xlu1 %153 }
 0xe40   :  { %578 = vrot.lane.b32.xlu0 %v576_v44, %s2541_s7  ;;  %v178_v46 = vmul.f32 %v2627_v34, %v154_v28 }
 0xe42   :  { %v190_v47 = vadd.f32 %v2632_v36, %v178_v46 }
 0xeb2   :  { %v579_v45 = vpop.permute.xlu0 %578 }
 0xeb3   :  { %2190 = vmatmul.mubr.msk.bf16.vlgmr.msra.gmra.mrb[12].mxu0 %vm214_vm5, %v579_v45 }
 0xeb4   :  { %2202 = vmatpush3.bf16.msra.mxu0 %v2590_v6  ;;  %2205 = vmatprep.mubr.msk.bf16.mxu0 %vm2537_vm0, %v2538_v1 }
 0xeb5   :  { %2203 = vmatprep.subr.bf16.mxu0 %v2538_v1 }
 0xeb8   :  { %2204 = vmatpush3.bf16.msra.mxu0 %v2592_v7 }
 0xeb9   :  { %2221 = vmatprep.subr.bf16.mxu0 %v2538_v1 }
 0xf86   :  { %v617_v49 = vpop.f32.mrb[12].mxu0 }
 0xf87   :  { %v623_v50 = vadd.f32 %v617_v49, %v190_v47  ;;  %v2191_v25 = vpop.f32.mrb[13].mxu0 }
 0xf88   :  { %v620_v51 = vpop.f32.mrb[14].mxu0 }
 0xf89   :  { %v1993_v52 = vmul.f32 -1.442695, %v623_v50  ;;  %v2192_v6 = vpop.f32.mrb[15].mxu0 }
 0xf8b   :  { %2443 = vpow2.f32 %v1993_v52 }
 0xf95   :  { %v2444_v54 = vpop.eup %2443 }
 0xf96   :  { %v627_v55 = vadd.f32 1.0, %v2444_v54 }
 0xf98   :  { %2445 = vrcp.f32 %v627_v55 }
 0xfa2   :  { %v2446_v56 = vpop.eup %2445 }
 0xfa3   :  { %v630_v57 = vmul.f32 2.0, %v2446_v56  ;;  %v632_v60 = vmul.f32 %v2446_v56, %v569_v40 }
 0xfa5   :  { %v1994_v7 = vadd.f32 -1.0, %v630_v57 }
 0xfa7   :  { %634 = vrot.lane.b32.xlu0 %v1994_v7, %s2534_s22 }
0x1019   :  { %v635_v58 = vpop.permute.xlu0 %634 }
0x101a   :  { %v637_v59 = vmul.f32 %v2446_v56, %v635_v58 }
0x101c   :  { %639 = vrot.lane.b32.xlu1 %v637_v59, %s2541_s7 }
0x108e   :  { %v640_v61 = vpop.permute.xlu1 %639 }
0x108f   :  { %v642_v62 = vadd.f32 %v640_v61, %v632_v60 }
0x1091   :  { %2447 = vtanh.f32 %v642_v62 }
0x109b   :  { %v2448_v63 = vpop.eup %2447 }
0x109c   :  { %645 = vrot.lane.b32.xlu0 %v2448_v63, %s2534_s22 }
0x10a0   :  { %160 = vbcast.lane.b32.xlu0 %v2620_v29, 256 }
0x110e   :  { %v646_v0 = vpop.permute.xlu0 %645 }
0x110f   :  { %v2728_v2 = vmul.f32 %v2446_v56, %v646_v0 }
0x1111   :  { %v649_v3 = vpack.c.bf16 %v2728_v2, %v2728_v2 }
0x1112   :  { %v161_v5 = vpop.permute.xlu0 %160 }
0x1113   :  { %651 = vrot.lane.b32.xlu1 %v649_v3, %s2541_s7  ;;  %v179_v9 = vmul.f32 %v2627_v34, %v161_v5 }
0x1115   :  { %v191_v10 = vadd.f32 %v2632_v36, %v179_v9 }
0x1185   :  { %v652_v4 = vpop.permute.xlu1 %651 }
0x1186   :  { %2198 = vmatmul.mubr.msk.bf16.vlgmr.msra.gmra.mrb[12].mxu1 %vm214_vm5, %v652_v4 }
0x1187   :  { %2210 = vmatpush3.bf16.msra.mxu1 %v2393_v32 }
0x1188   :  { %2211 = vmatprep.subr.bf16.mxu1 %v2394_v37 }
0x118b   :  { %2212 = vmatpush3.bf16.msra.mxu1 %v2394_v37 }
0x118c   :  { %2237 = vmatprep.subr.bf16.mxu1 %v2538_v1 }
0x1259   :  { %v690_v11 = vpop.f32.mrb[12].mxu1 }
0x125a   :  { %v696_v13 = vadd.f32 %v690_v11, %v191_v10  ;;  %v2199_v14 = vpop.f32.mrb[13].mxu1 }
0x125b   :  { %v693_v29 = vpop.f32.mrb[14].mxu1 }
0x125c   :  { %v1996_v27 = vmul.f32 -1.442695, %v696_v13  ;;  %v2200_v15 = vpop.f32.mrb[15].mxu1 }
0x125e   :  { %2449 = vpow2.f32 %v1996_v27 }
0x1268   :  { %v2450_v16 = vpop.eup %2449 }
0x1269   :  { %v700_v18 = vadd.f32 1.0, %v2450_v16 }
0x126b   :  { %2451 = vrcp.f32 %v700_v18 }
0x1275   :  { %v2452_v19 = vpop.eup %2451 }
0x1276   :  { %v703_v20 = vmul.f32 2.0, %v2452_v19  ;;  %v705_v24 = vmul.f32 %v2452_v19, %v642_v62 }
0x1278   :  { %v1997_v21 = vadd.f32 -1.0, %v703_v20 }
0x127a   :  { %707 = vrot.lane.b32.xlu1 %v1997_v21, %s2534_s22  ;;  %v806_v21 = vpack.c.bf16 %v2728_v2, %v2710_v43 }
0x12ec   :  { %v708_v22 = vpop.permute.xlu1 %707 }
0x12ed   :  { %v710_v23 = vmul.f32 %v2452_v19, %v708_v22 }
0x12ef   :  { %712 = vrot.lane.b32.xlu0 %v710_v23, %s2541_s7  ;;  %v2397_v23 = vld [vmem:[#allocation2 + $0x30] sm:$0xff]  }
0x1361   :  { %v713_v26 = vpop.permute.xlu0 %712 }
0x1362   :  { %v2738_v31 = vadd.f32 %v713_v26, %v705_v24  ;;  %v2398_v24 = vld [vmem:[#allocation2 + $0x38] sm:$0xff]  }
0x1364   :  { %2453 = vtanh.f32 %v2738_v31 }
0x136e   :  { %v2454_v33 = vpop.eup %2453 }
0x136f   :  { %718 = vrot.lane.b32.xlu1 %v2454_v33, %s2534_s22 }
0x1373   :  { %816 = vrot.lane.b32.xlu1 %v804_v35, %s2541_s7 }
0x1377   :  { %167 = vbcast.lane.b32.xlu1 %v2622_v30, 256  ;;  %v2756_v30 = vld [vmem:[#allocation2 + $0x20] sm:$0xff]  }
0x13e1   :  { %v719_v38 = vpop.permute.xlu1 %718 }
0x13e2   :  { %v2747_v39 = vmul.f32 %v2452_v19, %v719_v38 }
0x13e4   :  { %v722_v40 = vpack.c.bf16 %v2747_v39, %v2747_v39 }
0x13e5   :  { %v817_v41 = vpop.permute.xlu1 %816 }
0x13e6   :  { %724 = vrot.lane.b32.xlu0 %v722_v40, %s2541_s7  ;;  %2213 = vmatprep.mubr.msk.bf16.mxu1 %vm214_vm5, %v817_v41 }
0x13e9   :  { %v168_v48 = vpop.permute.xlu1 %167 }
0x13ea   :  { %818 = vrot.lane.b32.xlu0 %v805_v53, %s2541_s7  ;;  %v180_v12 = vmul.f32 %v2627_v34, %v168_v48 }
0x13ec   :  { %v192_v45 = vadd.f32 %v2632_v36, %v180_v12 }
0x1458   :  { %v725_v17 = vpop.permute.xlu0 %724 }
0x1459   :  { %2206 = vmatmul.mubr.msk.bf16.vlgmr.msra.gmra.mrb[16].mxu0 %vm214_vm5, %v725_v17 }
0x145a   :  { %2222 = vmatpush3.bf16.msra.mxu0 %v2756_v30  ;;  %2225 = vmatprep.mubr.msk.bf16.mxu0 %vm2537_vm0, %v2538_v1 }
0x145b   :  { %2223 = vmatprep.subr.bf16.mxu0 %v2538_v1 }
0x145c   :  { %v819_v44 = vpop.permute.xlu0 %818 }
0x145d   :  { %2214 = vmatmul.mubr.msk.bf16.vlgmr.msra.gmra.mrb[16].mxu1 %vm214_vm5, %v819_v44 }
0x145e   :  { %2224 = vmatpush3.bf16.msra.mxu0 %v2760_v42  ;;  %2238 = vmatpush3.bf16.msra.mxu1 %v2756_v30 }
0x145f   :  { %2239 = vmatprep.subr.bf16.mxu1 %v2538_v1  ;;  %2229 = vmatprep.subr.bf16.mxu0 %v2538_v1 }
0x1461   :  { %2226 = vmatmul.mubr.bf16.vlgmr.msra.gmra.mrb[20].mxu0 %v2540_v8  ;;  %v2780_v8 = vld [vmem:[%s2942_s1 + $0xa] ss:$0 sm:$0xff] }
0x1462   :  { %2240 = vmatpush3.bf16.msra.mxu1 %v2760_v42  ;;  %2233 = vmatprep.mubr.msk.bf16.mxu0 %vm2537_vm0, %v2538_v1 }
0x1463   :  { %2253 = vmatprep.subr.bf16.mxu1 %v2538_v1  ;;  %2230 = vmatpush3.bf16.msra.mxu0 %v2397_v23 }
0x1464   :  { %2231 = vmatprep.subr.bf16.mxu0 %v2538_v1 }
0x1467   :  { %2232 = vmatpush3.bf16.msra.mxu0 %v2398_v24 }
0x1468   :  { %2245 = vmatprep.subr.bf16.mxu0 %v2538_v1 }
0x152c   :  { %v763_v28 = vpop.f32.mrb[16].mxu0 }
0x152d   :  { %v769_v46 = vadd.f32 %v763_v28, %v192_v45  ;;  %v2207_v47 = vpop.f32.mrb[17].mxu0 }
0x152e   :  { %v766_v49 = vpop.f32.mrb[18].mxu0 }
0x152f   :  { %v1999_v50 = vmul.f32 -1.442695, %v769_v46  ;;  %v2208_v25 = vpop.f32.mrb[19].mxu0 }
0x1530   :  { %v2782_v51 = vpop.f32.mrb[16].mxu1 }
0x1531   :  { %2455 = vpow2.f32 %v1999_v50  ;;  %v882_v52 = vpop.f32.mrb[17].mxu1 }
0x1532   :  { %v883_v6 = vadd.f32 %v2780_v8, %v882_v52  ;;  %v2785_v34 = vpop.f32.mrb[18].mxu1 }
0x1533   :  { %v2787_v36 = vpop.f32.mrb[19].mxu1 }
0x1534   :  { %v959_v54 = vpop.f32.mrb[20].mxu0  ;;  %v886_v17 = vadd.f32 %v2780_v8, %v2787_v36 }
0x1535   :  { %v965_v55 = vadd.f32 %v959_v54, %v883_v6  ;;  %v2227_v56 = vpop.f32.mrb[21].mxu0 }
0x1536   :  { %v962_v57 = vpop.f32.mrb[22].mxu0 }
0x1537   :  { %v2010_v7 = vmul.f32 -1.442695, %v965_v55  ;;  %v2228_v58 = vpop.f32.mrb[23].mxu0  ;;  %v2399_v57 = vld [vmem:[#allocation2 + $0x40] sm:$0xff]  }
0x1539   :  { %2457 = vpow2.f32 %v2010_v7  ;;  %v2400_v7 = vld [vmem:[#allocation2 + $0x48] sm:$0xff]  }
0x153b   :  { %v2456_v59 = vpop.eup %2455 }
0x153c   :  { %v773_v60 = vadd.f32 1.0, %v2456_v59 }
0x153e   :  { %2459 = vrcp.f32 %v773_v60 }
0x1543   :  { %v2458_v61 = vpop.eup %2457 }
0x1544   :  { %v969_v62 = vadd.f32 1.0, %v2458_v61 }
0x1546   :  { %2461 = vrcp.f32 %v969_v62 }
0x1548   :  { %v2460_v63 = vpop.eup %2459 }
0x1549   :  { %v776_v0 = vmul.f32 2.0, %v2460_v63  ;;  %v778_v29 = vmul.f32 %v2460_v63, %v2738_v31 }
0x154b   :  { %v2000_v3 = vadd.f32 -1.0, %v776_v0 }
0x154d   :  { %780 = vrot.lane.b32.xlu0 %v2000_v3, %s2534_s22 }
0x1550   :  { %v2462_v4 = vpop.eup %2461 }
0x1551   :  { %v972_v5 = vmul.f32 2.0, %v2462_v4  ;;  %v974_v16 = vmul.f32 0.0, %v2462_v4 }
0x1553   :  { %v2011_v9 = vadd.f32 -1.0, %v972_v5 }
0x1555   :  { %976 = vrot.lane.b32.xlu1 %v2011_v9, %s2534_s22 }
0x15bf   :  { %v781_v10 = vpop.permute.xlu0 %780 }
0x15c0   :  { %v783_v11 = vmul.f32 %v2460_v63, %v781_v10 }
0x15c2   :  { %785 = vrot.lane.b32.xlu0 %v783_v11, %s2541_s7 }
0x15c7   :  { %v977_v13 = vpop.permute.xlu1 %976 }
0x15c8   :  { %v979_v14 = vmul.f32 %v2462_v4, %v977_v13 }
0x15ca   :  { %981 = vrot.lane.b32.xlu1 %v979_v14, %s2541_s7 }
0x1634   :  { %v786_v27 = vpop.permute.xlu0 %785 }
0x1635   :  { %v788_v15 = vadd.f32 %v786_v27, %v778_v29 }
0x1637   :  { %2463 = vtanh.f32 %v788_v15 }
0x163c   :  { %v982_v18 = vpop.permute.xlu1 %981 }
0x163d   :  { %v984_v19 = vadd.f32 %v982_v18, %v974_v16 }
0x163f   :  { %2465 = vtanh.f32 %v984_v19 }
0x1641   :  { %v2464_v20 = vpop.eup %2463 }
0x1642   :  { %791 = vrot.lane.b32.xlu0 %v2464_v20, %s2534_s22  ;;  %v2401_v20 = vld [vmem:[#allocation2 + $0x50] sm:$0xff]  }
0x1646   :  { %820 = vrot.lane.b32.xlu0 %v806_v21, %s2541_s7  ;;  %v2402_v21 = vld [vmem:[#allocation2 + $0x58] sm:$0xff]  }
0x1649   :  { %v2466_v22 = vpop.eup %2465 }
0x164a   :  { %987 = vrot.lane.b32.xlu1 %v2466_v22, %s2534_s22 }
0x16b4   :  { %v792_v26 = vpop.permute.xlu0 %791 }
0x16b5   :  { %v794_v31 = vmul.f32 %v2460_v63, %v792_v26  ;;  %v891_v63 = vadd.f32 %v2782_v51, %v2780_v8 }
0x16b7   :  { %v807_v32 = vpack.c.bf16 %v794_v31, %v2747_v39 }
0x16b8   :  { %v821_v33 = vpop.permute.xlu0 %820 }
0x16b9   :  { %2217 = vmatprep.mubr.msk.bf16.mxu1 %vm214_vm5, %v821_v33  ;;  %822 = vrot.lane.b32.xlu1 %v807_v32, %s2541_s7  ;;  %v894_v32 = vadd.f32 %v2785_v34, %v2780_v8 }
0x16bc   :  { %v988_v43 = vpop.permute.xlu1 %987 }
0x16bd   :  { %v990_v2 = vmul.f32 %v2462_v4, %v988_v43 }
0x16bf   :  { %v995_v35 = vpack.c.bf16 %v990_v2, %v990_v2 }
0x16c1   :  { %997 = vrot.lane.b32.xlu0 %v995_v35, %s2541_s7 }
0x172b   :  { %v823_v37 = vpop.permute.xlu1 %822 }
0x172c   :  { %2218 = vmatmul.mubr.msk.bf16.gmra.mrb[20].mxu1 %vm214_vm5, %v823_v37 }
0x172d   :  { %2241 = vmatprep.mubr.msk.bf16.mxu1 %vm2537_vm0, %v2538_v1 }
0x1733   :  { %v998_v38 = vpop.permute.xlu0 %997 }
0x1734   :  { %2234 = vmatmul.mubr.msk.bf16.vlgmr.msra.gmra.mrb[24].mxu0 %vm214_vm5, %v998_v38  ;;  %2242 = vmatmul.mubr.msk.bf16.vlgmr.msra.gmra.mrb[24].mxu1 %vm214_vm5, %v998_v38 }
0x1735   :  { %2254 = vmatpush3.bf16.msra.mxu1 %v2756_v30  ;;  %2249 = vmatprep.mubr.msk.bf16.mxu0 %vm2537_vm0, %v2538_v1 }
0x1736   :  { %2255 = vmatprep.subr.bf16.mxu1 %v2538_v1  ;;  %2257 = vmatprep.mubr.msk.bf16.mxu1 %vm2537_vm0, %v2538_v1 }
0x1737   :  { %2246 = vmatpush3.bf16.msra.mxu0 %v2399_v57 }
0x1738   :  { %2247 = vmatprep.subr.bf16.mxu0 %v2538_v1 }
0x1739   :  { %2256 = vmatpush3.bf16.msra.mxu1 %v2760_v42 }
0x173a   :  { %2269 = vmatprep.subr.bf16.mxu1 %v2538_v1 }
0x173b   :  { %2248 = vmatpush3.bf16.msra.mxu0 %v2400_v7 }
0x173c   :  { %2261 = vmatprep.subr.bf16.mxu0 %v2538_v1 }
0x17ff   :  { %v2818_v39 = vpop.f32.mrb[20].mxu1 }
0x1800   :  { %v2820_v40 = vpop.f32.mrb[21].mxu1 }
0x1801   :  { %v2822_v41 = vpop.f32.mrb[22].mxu1 }
0x1802   :  { %v2824_v53 = vpop.f32.mrb[23].mxu1 }
0x1807   :  { %v1089_v44 = vpop.f32.mrb[24].mxu1 }
0x1808   :  { %v1095_v48 = vadd.f32 %v1089_v44, %v886_v17  ;;  %v2243_v12 = vpop.f32.mrb[25].mxu1 }
0x1809   :  { %v1092_v45 = vpop.f32.mrb[26].mxu1 }
0x180a   :  { %v2016_v28 = vmul.f32 -1.442695, %v1095_v48  ;;  %v2244_v46 = vpop.f32.mrb[27].mxu1 }
0x180c   :  { %2467 = vpow2.f32 %v2016_v28 }
0x1816   :  { %v2468_v47 = vpop.eup %2467 }
0x1817   :  { %v1099_v49 = vadd.f32 1.0, %v2468_v47 }
0x1819   :  { %2469 = vrcp.f32 %v1099_v49 }
0x1823   :  { %v2470_v50 = vpop.eup %2469 }
0x1824   :  { %v1102_v25 = vmul.f32 2.0, %v2470_v50  ;;  %v1104_v36 = vmul.f32 %v2470_v50, %v984_v19 }
0x1826   :  { %v2017_v52 = vadd.f32 -1.0, %v1102_v25  ;;  %v2404_v25 = vld [vmem:[#allocation2 + $0x68] sm:$0xff]  }
0x1828   :  { %1106 = vrot.lane.b32.xlu1 %v2017_v52, %s2534_s22 }
0x189a   :  { %v1107_v6 = vpop.permute.xlu1 %1106 }
0x189b   :  { %v1109_v54 = vmul.f32 %v2470_v50, %v1107_v6 }
0x189d   :  { %1111 = vrot.lane.b32.xlu0 %v1109_v54, %s2541_s7 }
0x190f   :  { %v1112_v55 = vpop.permute.xlu0 %1111 }
0x1910   :  { %v1114_v56 = vadd.f32 %v1112_v55, %v1104_v36 }
0x1912   :  { %2471 = vtanh.f32 %v1114_v56 }
0x191c   :  { %v2472_v58 = vpop.eup %2471 }
0x191d   :  { %1117 = vrot.lane.b32.xlu1 %v2472_v58, %s2534_s22 }
0x198f   :  { %v1118_v59 = vpop.permute.xlu1 %1117 }
0x1990   :  { %v1120_v60 = vmul.f32 %v2470_v50, %v1118_v59  ;;  %v2403_v50 = vld [vmem:[#allocation2 + $0x60] sm:$0xff]  }
0x1992   :  { %v1125_v61 = vpack.c.bf16 %v1120_v60, %v1120_v60 }
0x1994   :  { %1127 = vrot.lane.b32.xlu0 %v1125_v61, %s2541_s7 }
0x1a06   :  { %v1128_v62 = vpop.permute.xlu0 %1127 }
0x1a07   :  { %2250 = vmatmul.mubr.msk.bf16.vlgmr.msra.gmra.mrb[24].mxu0 %vm214_vm5, %v1128_v62  ;;  %2258 = vmatmul.mubr.msk.bf16.vlgmr.msra.gmra.mrb[28].mxu1 %vm214_vm5, %v1128_v62 }
0x1a08   :  { %2270 = vmatpush3.bf16.msra.mxu1 %v2756_v30  ;;  %2265 = vmatprep.mubr.msk.bf16.mxu0 %vm2537_vm0, %v2538_v1 }
0x1a09   :  { %2271 = vmatprep.subr.bf16.mxu1 %v2538_v1  ;;  %2273 = vmatprep.mubr.msk.bf16.mxu1 %vm2537_vm0, %v2538_v1 }
0x1a0a   :  { %2262 = vmatpush3.bf16.msra.mxu0 %v2401_v20 }
0x1a0b   :  { %2263 = vmatprep.subr.bf16.mxu0 %v2538_v1 }
0x1a0c   :  { %2272 = vmatpush3.bf16.msra.mxu1 %v2760_v42 }
0x1a0d   :  { %2285 = vmatprep.subr.bf16.mxu1 %v2538_v1 }
0x1a0e   :  { %2264 = vmatpush3.bf16.msra.mxu0 %v2402_v21 }
0x1a0f   :  { %2277 = vmatprep.subr.bf16.mxu0 %v2538_v1 }
0x1ada   :  { %v1219_v0 = vpop.f32.mrb[28].mxu1 }
0x1adb   :  { %v1225_v3 = vadd.f32 %v1219_v0, %v891_v63  ;;  %v2259_v4 = vpop.f32.mrb[29].mxu1 }
0x1adc   :  { %v1222_v5 = vpop.f32.mrb[30].mxu1 }
0x1add   :  { %v2022_v9 = vmul.f32 -1.442695, %v1225_v3  ;;  %v2260_v10 = vpop.f32.mrb[31].mxu1 }
0x1adf   :  { %2473 = vpow2.f32 %v2022_v9 }
0x1ae9   :  { %v2474_v11 = vpop.eup %2473 }
0x1aea   :  { %v1229_v13 = vadd.f32 1.0, %v2474_v11 }
0x1aec   :  { %2475 = vrcp.f32 %v1229_v13  ;;  %v2405_v13 = vld [vmem:[#allocation2 + $0x70] sm:$0xff]  }
0x1af6   :  { %v2476_v14 = vpop.eup %2475 }
0x1af7   :  { %v1232_v29 = vmul.f32 2.0, %v2476_v14  ;;  %v1234_v51 = vmul.f32 %v2476_v14, %v1114_v56  ;;  %v899_v56 = vadd.f32 %v2780_v8, %v2820_v40 }
0x1af9   :  { %v2023_v27 = vadd.f32 -1.0, %v1232_v29 }
0x1afb   :  { %1236 = vrot.lane.b32.xlu1 %v2023_v27, %s2534_s22 }
0x1b6d   :  { %v1237_v15 = vpop.permute.xlu1 %1236 }
0x1b6e   :  { %v1239_v16 = vmul.f32 %v2476_v14, %v1237_v15 }
0x1b70   :  { %1241 = vrot.lane.b32.xlu0 %v1239_v16, %s2541_s7 }
0x1be2   :  { %v1242_v18 = vpop.permute.xlu0 %1241 }
0x1be3   :  { %v1244_v19 = vadd.f32 %v1242_v18, %v1234_v51  ;;  %v902_v18 = vadd.f32 %v2780_v8, %v2824_v53 }
0x1be5   :  { %2477 = vtanh.f32 %v1244_v19 }
0x1bef   :  { %v2478_v22 = vpop.eup %2477 }
0x1bf0   :  { %1247 = vrot.lane.b32.xlu1 %v2478_v22, %s2534_s22 }
0x1c62   :  { %v1248_v23 = vpop.permute.xlu1 %1247 }
0x1c63   :  { %v1250_v24 = vmul.f32 %v2476_v14, %v1248_v23  ;;  %v2406_v14 = vld [vmem:[#allocation2 + $0x78] sm:$0xff]  }
0x1c65   :  { %v1255_v26 = vpack.c.bf16 %v1250_v24, %v1250_v24 }
0x1c67   :  { %1257 = vrot.lane.b32.xlu0 %v1255_v26, %s2541_s7 }
0x1cd9   :  { %v1258_v31 = vpop.permute.xlu0 %1257 }
0x1cda   :  { %2266 = vmatmul.mubr.msk.bf16.vlgmr.msra.gmra.mrb[24].mxu0 %vm214_vm5, %v1258_v31  ;;  %2274 = vmatmul.mubr.msk.bf16.vlgmr.msra.gmra.mrb[32].mxu1 %vm214_vm5, %v1258_v31 }
0x1cdb   :  { %2286 = vmatpush3.bf16.msra.mxu1 %v2756_v30  ;;  %2281 = vmatprep.mubr.msk.bf16.mxu0 %vm2537_vm0, %v2538_v1 }
0x1cdc   :  { %2287 = vmatprep.subr.bf16.mxu1 %v2538_v1  ;;  %2289 = vmatprep.mubr.msk.bf16.mxu1 %vm2537_vm0, %v2538_v1 }
0x1cdd   :  { %2278 = vmatpush3.bf16.msra.mxu0 %v2403_v50 }
0x1cde   :  { %2279 = vmatprep.subr.bf16.mxu0 %v2538_v1 }
0x1cdf   :  { %2288 = vmatpush3.bf16.msra.mxu1 %v2760_v42 }
0x1ce0   :  { %2301 = vmatprep.subr.bf16.mxu1 %v2538_v1 }
0x1ce1   :  { %2280 = vmatpush3.bf16.msra.mxu0 %v2404_v25 }
0x1ce2   :  { %2293 = vmatprep.subr.bf16.mxu0 %v2538_v1 }
0x1dad   :  { %v1349_v33 = vpop.f32.mrb[32].mxu1 }
0x1dae   :  { %v1355_v43 = vadd.f32 %v1349_v33, %v894_v32  ;;  %v2275_v2 = vpop.f32.mrb[33].mxu1 }
0x1daf   :  { %v1352_v35 = vpop.f32.mrb[34].mxu1 }
0x1db0   :  { %v2028_v37 = vmul.f32 -1.442695, %v1355_v43  ;;  %v2276_v38 = vpop.f32.mrb[35].mxu1 }
0x1db2   :  { %2479 = vpow2.f32 %v2028_v37 }
0x1dbc   :  { %v2480_v17 = vpop.eup %2479 }
0x1dbd   :  { %v1359_v44 = vadd.f32 1.0, %v2480_v17  ;;  %v2407_v17 = vld [vmem:[#allocation2 + $0x80] sm:$0xff]  }
0x1dbf   :  { %2481 = vrcp.f32 %v1359_v44  ;;  %v2408_v44 = vld [vmem:[#allocation2 + $0x88] sm:$0xff]  }
0x1dc9   :  { %v2482_v48 = vpop.eup %2481 }
0x1dca   :  { %v1362_v12 = vmul.f32 2.0, %v2482_v48  ;;  %v1364_v34 = vmul.f32 %v2482_v48, %v1244_v19 }
0x1dcc   :  { %v2029_v45 = vadd.f32 -1.0, %v1362_v12 }
0x1dce   :  { %1366 = vrot.lane.b32.xlu1 %v2029_v45, %s2534_s22 }
0x1e40   :  { %v1367_v28 = vpop.permute.xlu1 %1366 }
0x1e41   :  { %v1369_v46 = vmul.f32 %v2482_v48, %v1367_v28 }
0x1e43   :  { %1371 = vrot.lane.b32.xlu0 %v1369_v46, %s2541_s7 }
0x1eb5   :  { %v1372_v47 = vpop.permute.xlu0 %1371 }
0x1eb6   :  { %v1374_v49 = vadd.f32 %v1372_v47, %v1364_v34  ;;  %v907_v34 = vadd.f32 %v2818_v39, %v2780_v8 }
0x1eb8   :  { %2483 = vtanh.f32 %v1374_v49 }
0x1ec2   :  { %v2484_v52 = vpop.eup %2483 }
0x1ec3   :  { %1377 = vrot.lane.b32.xlu1 %v2484_v52, %s2534_s22 }
0x1f35   :  { %v1378_v6 = vpop.permute.xlu1 %1377 }
0x1f36   :  { %v1380_v54 = vmul.f32 %v2482_v48, %v1378_v6 }
0x1f38   :  { %v1385_v36 = vpack.c.bf16 %v1380_v54, %v1380_v54 }
0x1f3a   :  { %1387 = vrot.lane.b32.xlu0 %v1385_v36, %s2541_s7 }
0x1fac   :  { %v1388_v55 = vpop.permute.xlu0 %1387 }
0x1fad   :  { %2282 = vmatmul.mubr.msk.bf16.vlgmr.msra.gmra.mrb[24].mxu0 %vm214_vm5, %v1388_v55  ;;  %2290 = vmatmul.mubr.msk.bf16.vlgmr.msra.gmra.mrb[36].mxu1 %vm214_vm5, %v1388_v55 }
0x1fae   :  { %2302 = vmatpush3.bf16.msra.mxu1 %v2756_v30  ;;  %2297 = vmatprep.mubr.msk.bf16.mxu0 %vm2537_vm0, %v2538_v1 }
0x1faf   :  { %2303 = vmatprep.subr.bf16.mxu1 %v2538_v1  ;;  %2305 = vmatprep.mubr.msk.bf16.mxu1 %vm2537_vm0, %v2538_v1 }
0x1fb0   :  { %2294 = vmatpush3.bf16.msra.mxu0 %v2405_v13 }
0x1fb1   :  { %2295 = vmatprep.subr.bf16.mxu0 %v2538_v1 }
0x1fb2   :  { %2304 = vmatpush3.bf16.msra.mxu1 %v2760_v42 }
0x1fb3   :  { %2317 = vmatprep.subr.bf16.mxu1 %v2538_v1 }
0x1fb4   :  { %2296 = vmatpush3.bf16.msra.mxu0 %v2406_v14 }
0x1fb5   :  { %2309 = vmatprep.subr.bf16.mxu0 %v2538_v1 }
0x2080   :  { %v1479_v57 = vpop.f32.mrb[36].mxu1 }
0x2081   :  { %v1485_v7 = vadd.f32 %v1479_v57, %v899_v56  ;;  %v2291_v58 = vpop.f32.mrb[37].mxu1 }
0x2082   :  { %v1482_v59 = vpop.f32.mrb[38].mxu1 }
0x2083   :  { %v2034_v60 = vmul.f32 -1.442695, %v1485_v7  ;;  %v2292_v61 = vpop.f32.mrb[39].mxu1  ;;  %v2409_v59 = vld [vmem:[#allocation2 + $0x90] sm:$0xff]  }
0x2085   :  { %2485 = vpow2.f32 %v2034_v60  ;;  %v2410_v60 = vld [vmem:[#allocation2 + $0x98] sm:$0xff]  }
0x208f   :  { %v2486_v62 = vpop.eup %2485 }
0x2090   :  { %v1489_v63 = vadd.f32 1.0, %v2486_v62 }
0x2092   :  { %2487 = vrcp.f32 %v1489_v63 }
0x209c   :  { %v2488_v0 = vpop.eup %2487 }
0x209d   :  { %v1492_v3 = vmul.f32 2.0, %v2488_v0  ;;  %v1494_v40 = vmul.f32 %v2488_v0, %v1374_v49 }
0x209f   :  { %v2035_v4 = vadd.f32 -1.0, %v1492_v3 }
0x20a1   :  { %1496 = vrot.lane.b32.xlu1 %v2035_v4, %s2534_s22  ;;  %v910_v4 = vadd.f32 %v2822_v41, %v2780_v8 }
0x2113   :  { %v1497_v5 = vpop.permute.xlu1 %1496 }
0x2114   :  { %v1499_v9 = vmul.f32 %v2488_v0, %v1497_v5 }
0x2116   :  { %1501 = vrot.lane.b32.xlu0 %v1499_v9, %s2541_s7 }
0x2188   :  { %v1502_v10 = vpop.permute.xlu0 %1501 }
0x2189   :  { %v1504_v11 = vadd.f32 %v1502_v10, %v1494_v40 }
0x218b   :  { %2489 = vtanh.f32 %v1504_v11 }
0x2195   :  { %v2490_v29 = vpop.eup %2489 }
0x2196   :  { %1507 = vrot.lane.b32.xlu1 %v2490_v29, %s2534_s22 }
0x2208   :  { %v1508_v27 = vpop.permute.xlu1 %1507 }
0x2209   :  { %v1510_v15 = vmul.f32 %v2488_v0, %v1508_v27 }
0x220b   :  { %v1515_v16 = vpack.c.bf16 %v1510_v15, %v1510_v15 }
0x220d   :  { %1517 = vrot.lane.b32.xlu0 %v1515_v16, %s2541_s7 }
0x227f   :  { %v1518_v51 = vpop.permute.xlu0 %1517 }
0x2280   :  { %2298 = vmatmul.mubr.msk.bf16.vlgmr.msra.gmra.mrb[24].mxu0 %vm214_vm5, %v1518_v51  ;;  %2306 = vmatmul.mubr.msk.bf16.vlgmr.msra.gmra.mrb[40].mxu1 %vm214_vm5, %v1518_v51 }
0x2281   :  { %2318 = vmatpush3.bf16.msra.mxu1 %v2756_v30  ;;  %2321 = vmatprep.mubr.msk.bf16.mxu1 %vm2537_vm0, %v2538_v1 }
0x2282   :  { %2319 = vmatprep.subr.bf16.mxu1 %v2538_v1  ;;  %2313 = vmatprep.mubr.msk.bf16.mxu0 %vm2537_vm0, %v2538_v1 }
0x2283   :  { %2310 = vmatpush3.bf16.msra.mxu0 %v2407_v17 }
0x2284   :  { %2311 = vmatprep.subr.bf16.mxu0 %v2538_v1 }
0x2285   :  { %2320 = vmatpush3.bf16.msra.mxu1 %v2760_v42 }
0x2286   :  { %2333 = vmatprep.subr.bf16.mxu1 %v2538_v1 }
0x2287   :  { %2312 = vmatpush3.bf16.msra.mxu0 %v2408_v44 }
0x2288   :  { %2325 = vmatprep.subr.bf16.mxu0 %v2538_v1 }
0x2353   :  { %v1609_v19 = vpop.f32.mrb[40].mxu1 }
0x2354   :  { %v1615_v20 = vadd.f32 %v1609_v19, %v902_v18  ;;  %v2307_v21 = vpop.f32.mrb[41].mxu1 }
0x2355   :  { %v1612_v22 = vpop.f32.mrb[42].mxu1  ;;  %v2412_v21 = vld [vmem:[#allocation2 + $0xa8] sm:$0xff]  }
0x2356   :  { %v2040_v23 = vmul.f32 -1.442695, %v1615_v20  ;;  %v2308_v24 = vpop.f32.mrb[43].mxu1  ;;  %v2411_v20 = vld [vmem:[#allocation2 + $0xa0] sm:$0xff]  }
0x2358   :  { %2491 = vpow2.f32 %v2040_v23 }
0x2362   :  { %v2492_v26 = vpop.eup %2491 }
0x2363   :  { %v1619_v31 = vadd.f32 1.0, %v2492_v26 }
0x2365   :  { %2493 = vrcp.f32 %v1619_v31 }
0x236f   :  { %v2494_v32 = vpop.eup %2493 }
0x2370   :  { %v1622_v33 = vmul.f32 2.0, %v2494_v32  ;;  %v1624_v53 = vmul.f32 %v2494_v32, %v1504_v11 }
0x2372   :  { %v2041_v43 = vadd.f32 -1.0, %v1622_v33 }
0x2374   :  { %1626 = vrot.lane.b32.xlu1 %v2041_v43, %s2534_s22 }
0x23e6   :  { %v1627_v2 = vpop.permute.xlu1 %1626 }
0x23e7   :  { %v1629_v35 = vmul.f32 %v2494_v32, %v1627_v2 }
0x23e9   :  { %1631 = vrot.lane.b32.xlu0 %v1629_v35, %s2541_s7 }
0x245b   :  { %v1632_v37 = vpop.permute.xlu0 %1631 }
0x245c   :  { %v1634_v38 = vadd.f32 %v1632_v37, %v1624_v53 }
0x245e   :  { %2495 = vtanh.f32 %v1634_v38 }
0x2468   :  { %v2496_v48 = vpop.eup %2495 }
0x2469   :  { %1637 = vrot.lane.b32.xlu1 %v2496_v48, %s2534_s22 }
0x24db   :  { %v1638_v12 = vpop.permute.xlu1 %1637 }
0x24dc   :  { %v1640_v45 = vmul.f32 %v2494_v32, %v1638_v12  ;;  %v1975_v32 = vld [vmem:[%s2942_s1 + $0xb] ss:$0 sm:$0xff] }
0x24de   :  { %v1645_v28 = vpack.c.bf16 %v1640_v45, %v1640_v45 }
0x24e0   :  { %1647 = vrot.lane.b32.xlu0 %v1645_v28, %s2541_s7 }
0x2552   :  { %v1648_v46 = vpop.permute.xlu0 %1647 }
0x2553   :  { %2314 = vmatmul.mubr.msk.bf16.vlgmr.msra.gmra.mrb[24].mxu0 %vm214_vm5, %v1648_v46  ;;  %2322 = vmatmul.mubr.msk.bf16.vlgmr.msra.gmra.mrb[44].mxu1 %vm214_vm5, %v1648_v46 }
0x2554   :  { %2334 = vmatpush3.bf16.msra.mxu1 %v2756_v30  ;;  %2337 = vmatprep.mubr.msk.bf16.mxu1 %vm2537_vm0, %v2538_v1 }
0x2555   :  { %2335 = vmatprep.subr.bf16.mxu1 %v2538_v1  ;;  %2329 = vmatprep.mubr.msk.bf16.mxu0 %vm2537_vm0, %v2538_v1 }
0x2556   :  { %2326 = vmatpush3.bf16.msra.mxu0 %v2409_v59 }
0x2557   :  { %2327 = vmatprep.subr.bf16.mxu0 %v2538_v1 }
0x2558   :  { %2336 = vmatpush3.bf16.msra.mxu1 %v2760_v42 }
0x255a   :  { %2328 = vmatpush3.bf16.msra.mxu0 %v2410_v60 }
0x255b   :  { %2341 = vmatprep.subr.bf16.mxu0 %v2538_v1 }
0x2626   :  { %v1739_v47 = vpop.f32.mrb[44].mxu1 }
0x2627   :  { %v1745_v49 = vadd.f32 %v1739_v47, %v907_v34  ;;  %v2323_v50 = vpop.f32.mrb[45].mxu1 }
0x2628   :  { %v1742_v25 = vpop.f32.mrb[46].mxu1 }
0x2629   :  { %v2046_v52 = vmul.f32 -1.442695, %v1745_v49  ;;  %v2324_v6 = vpop.f32.mrb[47].mxu1 }
0x262b   :  { %2497 = vpow2.f32 %v2046_v52 }
0x2635   :  { %v2498_v30 = vpop.eup %2497 }
0x2636   :  { %v1749_v54 = vadd.f32 1.0, %v2498_v30 }
0x2638   :  { %2499 = vrcp.f32 %v1749_v54 }
0x2642   :  { %v2500_v36 = vpop.eup %2499 }
0x2643   :  { %v1752_v55 = vmul.f32 2.0, %v2500_v36  ;;  %v1754_v39 = vmul.f32 %v2500_v36, %v1634_v38 }
0x2645   :  { %v2047_v56 = vadd.f32 -1.0, %v1752_v55 }
0x2647   :  { %1756 = vrot.lane.b32.xlu1 %v2047_v56, %s2534_s22 }
0x26b9   :  { %v1757_v57 = vpop.permute.xlu1 %1756 }
0x26ba   :  { %v1759_v42 = vmul.f32 %v2500_v36, %v1757_v57 }
0x26bc   :  { %1761 = vrot.lane.b32.xlu0 %v1759_v42, %s2541_s7 }
0x272e   :  { %v1762_v7 = vpop.permute.xlu0 %1761 }
0x272f   :  { %v1764_v58 = vadd.f32 %v1762_v7, %v1754_v39 }
0x2731   :  { %2501 = vtanh.f32 %v1764_v58 }
0x273b   :  { %v2502_v61 = vpop.eup %2501 }
0x273c   :  { %1767 = vrot.lane.b32.xlu1 %v2502_v61, %s2534_s22 }
0x27ae   :  { %v1768_v62 = vpop.permute.xlu1 %1767 }
0x27af   :  { %v1770_v63 = vmul.f32 %v2500_v36, %v1768_v62 }
0x27b1   :  { %v1775_v0 = vpack.c.bf16 %v1770_v63, %v1770_v63 }
0x27b3   :  { %1777 = vrot.lane.b32.xlu0 %v1775_v0, %s2541_s7 }
0x2825   :  { %v1778_v3 = vpop.permute.xlu0 %1777 }
0x2826   :  { %2330 = vmatmul.mubr.msk.bf16.vlgmr.msra.gmra.mrb[24].mxu0 %vm214_vm5, %v1778_v3  ;;  %2338 = vmatmul.mubr.msk.bf16.vlgmr.msra.gmra.mrb[48].mxu1 %vm214_vm5, %v1778_v3 }
0x2827   :  { %2345 = vmatprep.mubr.msk.bf16.mxu0 %vm2537_vm0, %v2538_v1  ;;  %2342 = vmatpush3.bf16.msra.mxu0 %v2411_v20 }
0x2828   :  { %2343 = vmatprep.subr.bf16.mxu0 %v2538_v1 }
0x282b   :  { %2344 = vmatpush3.bf16.msra.mxu0 %v2412_v21 }
0x28f9   :  { %v1869_v5 = vpop.f32.mrb[48].mxu1 }
0x28fa   :  { %v1875_v9 = vadd.f32 %v1869_v5, %v910_v4  ;;  %v2339_v40 = vpop.f32.mrb[49].mxu1 }
0x28fb   :  { %v1872_v10 = vpop.f32.mrb[50].mxu1 }
0x28fc   :  { %v2052_v11 = vmul.f32 -1.442695, %v1875_v9  ;;  %v2340_v13 = vpop.f32.mrb[51].mxu1 }
0x28fe   :  { %2503 = vpow2.f32 %v2052_v11 }
0x2908   :  { %v2504_v14 = vpop.eup %2503 }
0x2909   :  { %v1879_v29 = vadd.f32 1.0, %v2504_v14 }
0x290b   :  { %2505 = vrcp.f32 %v1879_v29 }
0x2915   :  { %v2506_v27 = vpop.eup %2505 }
0x2916   :  { %v1882_v15 = vmul.f32 2.0, %v2506_v27  ;;  %v1884_v8 = vmul.f32 %v2506_v27, %v1764_v58 }
0x2918   :  { %v2053_v16 = vadd.f32 -1.0, %v1882_v15 }
0x291a   :  { %1886 = vrot.lane.b32.xlu1 %v2053_v16, %s2534_s22 }
0x298c   :  { %v1887_v51 = vpop.permute.xlu1 %1886 }
0x298d   :  { %v1889_v18 = vmul.f32 %v2506_v27, %v1887_v51 }
0x298f   :  { %1891 = vrot.lane.b32.xlu0 %v1889_v18, %s2541_s7 }
0x2a01   :  { %v1892_v41 = vpop.permute.xlu0 %1891 }
0x2a02   :  { %v1894_v19 = vadd.f32 %v1892_v41, %v1884_v8 }
0x2a04   :  { %2507 = vtanh.f32 %v1894_v19 }
0x2a0e   :  { %v2508_v22 = vpop.eup %2507 }
0x2a0f   :  { %1897 = vrot.lane.b32.xlu1 %v2508_v22, %s2534_s22 }
0x2a81   :  { %v1898_v23 = vpop.permute.xlu1 %1897 }
0x2a82   :  { %v1900_v24 = vmul.f32 %v2506_v27, %v1898_v23 }
0x2a84   :  { %v1905_v26 = vpack.c.bf16 %v1900_v24, %v1900_v24 }
0x2a86   :  { %1907 = vrot.lane.b32.xlu0 %v1905_v26, %s2541_s7 }
0x2af8   :  { %v1908_v31 = vpop.permute.xlu0 %1907 }
0x2af9   :  { %2346 = vmatmul.mubr.msk.bf16.vlgmr.msra.gmra.mrb[24].mxu0 %vm214_vm5, %v1908_v31 }
0x2bcc   :  { %v1958_v33 = vpop.f32.mrb[24].mxu0 }
0x2bcd   :  { %v2353_v43 = vadd.f32 %v1975_v32, %v1958_v33  ;;  %v2347_v2 = vpop.f32.mrb[25].mxu0 }
0x2bce   :  { %v1961_v1 = vpop.f32.mrb[26].mxu0 }
0x2bcf   :  { %1965 = vst [vmem:[%s2944_s3] sm:$0xff] %v2353_v43  ;;  %v2348_v35 = vpop.f32.mrb[27].mxu0 }
0x2bd0   :  { %1970 = vsyncpa [#allocation3], 1 }

</bundles_post_ra>
